<compile_context>
chip_gen: v7x
topology: tpu7x:2x2x1
jax: 0.10.0
libtpu: 0.0.40
codegen_flags: <defaults>
</compile_context>

<pallas_src>
import jax
import jax.numpy as jnp
import numpy as np
from jax import lax
from jax.experimental import pallas as pl
from jax.experimental.pallas import tpu as pltpu

D_FEAT = 640
D_SINGLE = 384
D_PAIR_HID = 512
D_PAIR_OUT = 128
D_MISC = 128                                     # col 0 = dms, col 1 = shape
D_HEAD_OUT = D_SINGLE + 2 * D_PAIR_HID + D_MISC  # 1536, lane-dense
VMEM_LIMIT = 48 * 1024 * 1024                    # < v7x's 64 MiB/TC, with headroom


def _round_up(x, m):
    return ((x + m - 1) // m) * m


# ---------------------------------------------------------------------------
# Tile selection (avoid padding blowups; keep >=2 parallel slices for v7x).
# ---------------------------------------------------------------------------
def _choose_pair_tiles(L, B):
    # Largest j tile whose induced row padding stays small (pair work ~ Lp^2).
    tj = 8
    for cand in (128, 64, 32, 16, 8):
        if _round_up(L, cand) - L <= max(L // 8, 7):
            tj = cand
            break
    Lp = _round_up(L, tj)
    # ti capped at 64 so the f32 output tile (1, ti, tj, 128) stays small.
    ti = min(64, tj)
    # Keep >=2 "parallel" grid slices so both v7x TensorCores get work.
    while B * (Lp // ti) < 2 and ti > 8:
        ti //= 2
    return ti, tj, Lp


def _choose_head_tile(Lp, B):
    for tl in (512, 256, 128, 64, 32, 16, 8):
        if Lp % tl == 0 and B * (Lp // tl) >= 2:
            return tl
    return 8          # Lp is always a multiple of 8


# ---------------------------------------------------------------------------
# Kernel 1: fused per-token heads (bf16 MXU, f32 accumulate).
#   acc = feat @ W_fused + b_fused    (640 -> 1536)
#   cols [0:384)     -> single_proj
#   cols [384:896)   -> pair_proj W1 half for feat_i   (no bias)
#   cols [896:1408)  -> pair_proj W1 half for feat_j   (b1 folded in)
#   cols [1408:1536) -> misc: dms (col 0), shape (col 1), rest zero pad
# Four lane-dense outputs, written directly in the padded (B, Lp, .) layout.
# ---------------------------------------------------------------------------
def heads_kernel(feat_ref, w_ref, b_ref, single_ref, pi_ref, pj_ref, misc_ref):
    acc = jnp.dot(feat_ref[0], w_ref[...],
                  preferred_element_type=jnp.float32) + b_ref[...]
    single_ref[0] = acc[:, :D_SINGLE]
    pi_ref[0] = acc[:, D_SINGLE:D_SINGLE + D_PAIR_HID]
    pj_ref[0] = acc[:, D_SINGLE + D_PAIR_HID:D_SINGLE + 2 * D_PAIR_HID]
    misc_ref[0] = acc[:, D_SINGLE + 2 * D_PAIR_HID:]


def run_heads(feat_b, w_fused, b_fused, tl):
    B, Lp, _ = feat_b.shape
    grid = (B, Lp // tl)
    const2d = lambda b, i: (0, 0)
    row_map = lambda b, i: (b, i, 0)
    return pl.pallas_call(
        heads_kernel,
        out_shape=(
            jax.ShapeDtypeStruct((B, Lp, D_SINGLE), jnp.float32),
            jax.ShapeDtypeStruct((B, Lp, D_PAIR_HID), jnp.float32),
            jax.ShapeDtypeStruct((B, Lp, D_PAIR_HID), jnp.float32),
            jax.ShapeDtypeStruct((B, Lp, D_MISC), jnp.float32),
        ),
        grid_spec=pltpu.PrefetchScalarGridSpec(
            num_scalar_prefetch=0,
            grid=grid,
            in_specs=[
                pl.BlockSpec((1, tl, D_FEAT), row_map),
                pl.BlockSpec((D_FEAT, D_HEAD_OUT), const2d),
                pl.BlockSpec((1, D_HEAD_OUT), const2d),
            ],
            out_specs=(
                pl.BlockSpec((1, tl, D_SINGLE), row_map),
                pl.BlockSpec((1, tl, D_PAIR_HID), row_map),
                pl.BlockSpec((1, tl, D_PAIR_HID), row_map),
                pl.BlockSpec((1, tl, D_MISC), row_map),
            ),
        ),
        compiler_params=pltpu.CompilerParams(
            dimension_semantics=("parallel", "parallel"),
            vmem_limit_bytes=VMEM_LIMIT),
    )(feat_b, w_fused, b_fused)


# ---------------------------------------------------------------------------
# Kernel 2: pair MLP with i-row sub-blocking (no full relu tensor).
#   for each sub-block of rows r:
#     h    = relu(pi[r] + pj)          f32, <= ~2 MiB
#     out  = bf16(h) @ W2_bf16 + b2    f32 accumulate
# ---------------------------------------------------------------------------
def pair_kernel(pi_ref, pj_ref, w2_ref, b2_ref, out_ref):
    ti = pi_ref.shape[1]
    tj = pj_ref.shape[1]
    rows = min(ti, 16, max(8, 1024 // tj))   # keep rows*tj <= 1024 (f32 h <= 2 MiB)
    n_sub = ti // rows

    pj = pj_ref[0]                           # (tj, 512) f32, VMEM-resident
    w2 = w2_ref[...]                         # (512, 128) bf16
    b2 = b2_ref[...]                         # (1, 128) f32

    def body(s, carry):
        r0 = s * rows
        pi_sub = pi_ref[0, pl.ds(r0, rows), :]                       # (rows, 512)
        h = jnp.maximum(pi_sub[:, None, :] + pj[None, :, :], 0.0)    # f32 add/relu
        hb = h.reshape(rows * tj, D_PAIR_HID).astype(jnp.bfloat16)
        o = jnp.dot(hb, w2, preferred_element_type=jnp.float32) + b2
        out_ref[0, pl.ds(r0, rows), :, :] = o.reshape(rows, tj, D_PAIR_OUT)
        return carry

    lax.fori_loop(0, n_sub, body, 0, unroll=True)


def run_pair(proj_i, proj_j, w2_bf16, b2, ti, tj):
    B, Lp, _ = proj_i.shape
    grid = (B, Lp // ti, Lp // tj)
    const2d = lambda b, i, j: (0, 0)
    return pl.pallas_call(
        pair_kernel,
        out_shape=jax.ShapeDtypeStruct((B, Lp, Lp, D_PAIR_OUT), jnp.float32),
        grid_spec=pltpu.PrefetchScalarGridSpec(
            num_scalar_prefetch=0,
            grid=grid,
            in_specs=[
                pl.BlockSpec((1, ti, D_PAIR_HID), lambda b, i, j: (b, i, 0)),
                pl.BlockSpec((1, tj, D_PAIR_HID), lambda b, i, j: (b, j, 0)),
                pl.BlockSpec((D_PAIR_HID, D_PAIR_OUT), const2d),
                pl.BlockSpec((1, D_PAIR_OUT), const2d),
            ],
            out_specs=pl.BlockSpec((1, ti, tj, D_PAIR_OUT),
                                   lambda b, i, j: (b, i, j, 0)),
        ),
        # j innermost + "arbitrary": proj_i / W2 / b2 blocks stay resident
        # across j; B and i shard across TensorCores on v7x.
        compiler_params=pltpu.CompilerParams(
            dimension_semantics=("parallel", "parallel", "arbitrary"),
            vmem_limit_bytes=VMEM_LIMIT),
    )(proj_i, proj_j, w2_bf16, b2)


# ---------------------------------------------------------------------------
# Fused head weight assembly (once, in the wrapper).
# ---------------------------------------------------------------------------
def _build_fused_head_weights(params):
    w_misc = jnp.concatenate(
        [params["wd"], params["wsh"],
         jnp.zeros((D_FEAT, D_MISC - 2), jnp.float32)], axis=1)
    b_misc = jnp.concatenate(
        [params["bd"], params["bsh"],
         jnp.zeros((1, D_MISC - 2), jnp.float32)], axis=1)
    w = jnp.concatenate([params["ws"], params["w1a"], params["w1b"], w_misc],
                        axis=1)
    b = jnp.concatenate([params["bs"],
                         jnp.zeros((1, D_PAIR_HID), jnp.float32),  # proj_i: no bias
                         params["b1"],                             # b1 folded into proj_j
                         b_misc], axis=1)
    return w.astype(jnp.bfloat16), b          # bf16 weights, f32 bias


# ---------------------------------------------------------------------------
# Full forward
# ---------------------------------------------------------------------------
def simplified_rhofold_forward(tokens, params):
    # TODO(synk): RNA-FM transformer replaced by a deterministic embedding
    # stand-in producing the (B, L, 640) features.
    features = params["embed"][tokens]          # (B, L, 640) f32
    B, L, _ = features.shape

    ti, tj, Lp = _choose_pair_tiles(L, B)
    tl = _choose_head_tile(Lp, B)

    feat_p = features
    if Lp != L:
        feat_p = jnp.pad(features, ((0, 0), (0, Lp - L), (0, 0)))
    feat_b = feat_p.astype(jnp.bfloat16)

    # ---- fused per-token heads (single / proj_i / proj_j / dms+shape) ----
    w_fused, b_fused = _build_fused_head_weights(params)
    single_p, pi_p, pj_p, misc_p = run_heads(feat_b, w_fused, b_fused, tl)

    single_rep = single_p[:, :L, :]
    dms = misc_p[:, :L, 0]
    shape_out = misc_p[:, :L, 1]

    # ---- pair MLP over the L x L grid ------------------------------------
    pair_p = run_pair(pi_p, pj_p, params["w2"].astype(jnp.bfloat16),
                      params["b2"], ti, tj)
    pair_rep = pair_p[:, :L, :L, :] if Lp != L else pair_p

    return {
        "rna_features": features,
        "single_rep": single_rep,
        "pair_rep": pair_rep,
        "dms": dms,
        "shape": shape_out,
        "shapes": {
            "rna_features": features.shape,
            "single_rep": single_rep.shape,
            "pair_rep": pair_rep.shape,
            "dms": dms.shape,
            "shape": shape_out.shape,
        },
    }


# ---------------------------------------------------------------------------
# Pure-JAX f32 reference (mirrors PyTorch forward semantics)
# ---------------------------------------------------------------------------
def reference_forward(tokens, params):
    features = params["embed"][tokens]
    B, L, D = features.shape
    single = features @ params["ws"] + params["bs"][0]
    dms = (features @ params["wd"] + params["bd"][0])[..., 0]
    shape_out = (features @ params["wsh"] + params["bsh"][0])[..., 0]
    fi = jnp.broadcast_to(features[:, :, None, :], (B, L, L, D))
    fj = jnp.broadcast_to(features[:, None, :, :], (B, L, L, D))
    pair_feat = jnp.concatenate([fi, fj], axis=-1)                 # (B,L,L,1280)
    w1 = jnp.concatenate([params["w1a"], params["w1b"]], axis=0)   # (1280,512)
    h = jnp.maximum(pair_feat @ w1 + params["b1"][0], 0.0)
    pair = h @ params["w2"] + params["b2"][0]
    return features, single, pair, dms, shape_out


def make_params(key, vocab_size=25):
    ks = jax.random.split(key, 10)
    def init(k, shape, scale=0.05):
        return (scale * jax.random.normal(k, shape)).astype(jnp.float32)
    return {
        "embed": init(ks[0], (vocab_size, D_FEAT), 0.5),
        "ws":  init(ks[1], (D_FEAT, D_SINGLE)),
        "bs":  init(ks[2], (1, D_SINGLE)),
        "wd":  init(ks[3], (D_FEAT, 1)),
        "bd":  init(ks[4], (1, 1)),
        "wsh": init(ks[5], (D_FEAT, 1)),
        "bsh": init(ks[6], (1, 1)),
        "w1a": init(ks[7], (D_FEAT, D_PAIR_HID)),
        "w1b": init(ks[8], (D_FEAT, D_PAIR_HID)),
        "b1":  jnp.zeros((1, D_PAIR_HID), jnp.float32) + 0.01,
        "w2":  init(ks[9], (D_PAIR_HID, D_PAIR_OUT)),
        "b2":  jnp.zeros((1, D_PAIR_OUT), jnp.float32) + 0.02,
    }


if __name__ == "__main__":
    key = jax.random.PRNGKey(0)
    pkey, tkey = jax.random.split(key)
    params = make_params(pkey)

    B, L = 2, 8
    tokens = jax.random.randint(tkey, (B, L), 0, 25, dtype=jnp.int32)

    out = simplified_rhofold_forward(tokens, params)
    jax.block_until_ready(out)

    feats_r, single_r, pair_r, dms_r, shape_r = reference_forward(tokens, params)

    # Features are an exact gather; head/pair outputs use the bf16 MXU path,
    # so tolerances vs the f32 reference are loosened (expected precision loss).
    np.testing.assert_allclose(np.asarray(out["rna_features"]),
                               np.asarray(feats_r), rtol=1e-5, atol=1e-5)
    np.testing.assert_allclose(np.asarray(out["single_rep"]),
                               np.asarray(single_r), rtol=3e-2, atol=3e-2)
    np.testing.assert_allclose(np.asarray(out["pair_rep"]),
                               np.asarray(pair_r), rtol=3e-2, atol=3e-2)
    np.testing.assert_allclose(np.asarray(out["dms"]),
                               np.asarray(dms_r), rtol=3e-2, atol=3e-2)
    np.testing.assert_allclose(np.asarray(out["shape"]),
                               np.asarray(shape_r), rtol=3e-2, atol=3e-2)

    assert out["shapes"]["rna_features"] == (B, L, 640)
    assert out["shapes"]["single_rep"] == (B, L, 384)
    assert out["shapes"]["pair_rep"] == (B, L, L, 128)
    assert out["shapes"]["dms"] == (B, L)
    assert out["shapes"]["shape"] == (B, L)

    print("KERNEL_OK")
</pallas_src>

<mosaic_0001>
module attributes {stable_mosaic.version = 11 : i64} {
  func.func @heads_kernel(%arg0: i32, %arg1: i32, %arg2: memref<1x8x640xbf16, #tpu.memory_space<vmem>>, %arg3: memref<640x1536xbf16, #tpu.memory_space<vmem>>, %arg4: memref<1x1536xf32, #tpu.memory_space<vmem>>, %arg5: memref<1x8x384xf32, #tpu.memory_space<vmem>>, %arg6: memref<1x8x512xf32, #tpu.memory_space<vmem>>, %arg7: memref<1x8x512xf32, #tpu.memory_space<vmem>>, %arg8: memref<1x8x128xf32, #tpu.memory_space<vmem>>) attributes {dimension_semantics = [#tpu.dimension_semantics<parallel>, #tpu.dimension_semantics<parallel>], iteration_bounds = array<i64: 2, 1>, scalar_prefetch = 0 : i64, scratch_operands = 0 : i64, tpu.core_type = #tpu.core_type<tc>, window_params = [{transform_indices = @transform_0, window_bounds = array<i64: 1, 8, 640>}, {pipeline_mode = #tpu.pipeline_mode<synchronous>, transform_indices = @transform_1, window_bounds = array<i64: 640, 1536>}, {pipeline_mode = #tpu.pipeline_mode<synchronous>, transform_indices = @transform_2, window_bounds = array<i64: 1, 1536>}, {transform_indices = @transform_3, window_bounds = array<i64: 1, 8, 384>}, {transform_indices = @transform_4, window_bounds = array<i64: 1, 8, 512>}, {transform_indices = @transform_5, window_bounds = array<i64: 1, 8, 512>}, {transform_indices = @transform_6, window_bounds = array<i64: 1, 8, 128>}]} {
    %c0 = arith.constant 0 : index
    %c0_0 = arith.constant 0 : index
    %c0_1 = arith.constant 0 : index
    %0 = vector.load %arg2[%c0, %c0_0, %c0_1] : memref<1x8x640xbf16, #tpu.memory_space<vmem>>, vector<1x8x640xbf16>
    %1 = vector.shape_cast %0 : vector<1x8x640xbf16> to vector<8x640xbf16>
    %c0_2 = arith.constant 0 : index
    %c0_3 = arith.constant 0 : index
    %2 = vector.load %arg3[%c0_2, %c0_3] : memref<640x1536xbf16, #tpu.memory_space<vmem>>, vector<640x1536xbf16>
    %cst = arith.constant dense<0.000000e+00> : vector<8x1536xf32>
    %3 = tpu.matmul %1, %2, %cst {dimension_numbers = #tpu.dot_dimension_numbers<[1], [0], [0], [1], [0, 0, 1, 1], [], []>} : vector<8x640xbf16>, vector<640x1536xbf16>, vector<8x1536xf32> -> vector<8x1536xf32>
    %c0_4 = arith.constant 0 : index
    %c0_5 = arith.constant 0 : index
    %4 = vector.load %arg4[%c0_4, %c0_5] : memref<1x1536xf32, #tpu.memory_space<vmem>>, vector<1x1536xf32>
    %5 = vector.broadcast %4 : vector<1x1536xf32> to vector<8x1536xf32>
    %6 = arith.addf %3, %5 : vector<8x1536xf32>
    %7 = vector.extract_strided_slice %6 {offsets = [0, 0], sizes = [8, 384], strides = [1, 1]} : vector<8x1536xf32> to vector<8x384xf32>
    %c0_6 = arith.constant 0 : index
    %c0_7 = arith.constant 0 : index
    %c0_8 = arith.constant 0 : index
    %8 = vector.load %arg5[%c0_6, %c0_7, %c0_8] : memref<1x8x384xf32, #tpu.memory_space<vmem>>, vector<1x8x384xf32>
    %9 = vector.shape_cast %8 : vector<1x8x384xf32> to vector<8x384xf32>
    %10 = vector.shape_cast %7 : vector<8x384xf32> to vector<1x8x384xf32>
    tpu.vector_store %arg5[%c0_6, %c0_7, %c0_8], %10 {strides = array<i32>} : memref<1x8x384xf32, #tpu.memory_space<vmem>>, vector<1x8x384xf32>,
    %11 = vector.extract_strided_slice %6 {offsets = [0, 384], sizes = [8, 512], strides = [1, 1]} : vector<8x1536xf32> to vector<8x512xf32>
    %c0_9 = arith.constant 0 : index
    %c0_10 = arith.constant 0 : index
    %c0_11 = arith.constant 0 : index
    %12 = vector.load %arg6[%c0_9, %c0_10, %c0_11] : memref<1x8x512xf32, #tpu.memory_space<vmem>>, vector<1x8x512xf32>
    %13 = vector.shape_cast %12 : vector<1x8x512xf32> to vector<8x512xf32>
    %14 = vector.shape_cast %11 : vector<8x512xf32> to vector<1x8x512xf32>
    tpu.vector_store %arg6[%c0_9, %c0_10, %c0_11], %14 {strides = array<i32>} : memref<1x8x512xf32, #tpu.memory_space<vmem>>, vector<1x8x512xf32>,
    %15 = vector.extract_strided_slice %6 {offsets = [0, 896], sizes = [8, 512], strides = [1, 1]} : vector<8x1536xf32> to vector<8x512xf32>
    %c0_12 = arith.constant 0 : index
    %c0_13 = arith.constant 0 : index
    %c0_14 = arith.constant 0 : index
    %16 = vector.load %arg7[%c0_12, %c0_13, %c0_14] : memref<1x8x512xf32, #tpu.memory_space<vmem>>, vector<1x8x512xf32>
    %17 = vector.shape_cast %16 : vector<1x8x512xf32> to vector<8x512xf32>
    %18 = vector.shape_cast %15 : vector<8x512xf32> to vector<1x8x512xf32>
    tpu.vector_store %arg7[%c0_12, %c0_13, %c0_14], %18 {strides = array<i32>} : memref<1x8x512xf32, #tpu.memory_space<vmem>>, vector<1x8x512xf32>,
    %19 = vector.extract_strided_slice %6 {offsets = [0, 1408], sizes = [8, 128], strides = [1, 1]} : vector<8x1536xf32> to vector<8x128xf32>
    %c0_15 = arith.constant 0 : index
    %c0_16 = arith.constant 0 : index
    %c0_17 = arith.constant 0 : index
    %20 = vector.load %arg8[%c0_15, %c0_16, %c0_17] : memref<1x8x128xf32, #tpu.memory_space<vmem>>, vector<1x8x128xf32>
    %21 = vector.shape_cast %20 : vector<1x8x128xf32> to vector<8x128xf32>
    %22 = vector.shape_cast %19 : vector<8x128xf32> to vector<1x8x128xf32>
    tpu.vector_store %arg8[%c0_15, %c0_16, %c0_17], %22 {strides = array<i32>} : memref<1x8x128xf32, #tpu.memory_space<vmem>>, vector<1x8x128xf32>,
    return
  }
  func.func @transform_0(%arg0: i32, %arg1: i32) -> (i32, i32, i32) {
    %c0_i32 = arith.constant 0 : i32
    %c0_i32_0 = arith.constant 0 : i32
    return %arg0, %arg1, %c0_i32 : i32, i32, i32
  }
  func.func @transform_1(%arg0: i32, %arg1: i32) -> (i32, i32) {
    %c0_i32 = arith.constant 0 : i32
    %c0_i32_0 = arith.constant 0 : i32
    %c0_i32_1 = arith.constant 0 : i32
    return %c0_i32, %c0_i32_0 : i32, i32
  }
  func.func @transform_2(%arg0: i32, %arg1: i32) -> (i32, i32) {
    %c0_i32 = arith.constant 0 : i32
    %c0_i32_0 = arith.constant 0 : i32
    %c0_i32_1 = arith.constant 0 : i32
    return %c0_i32, %c0_i32_0 : i32, i32
  }
  func.func @transform_3(%arg0: i32, %arg1: i32) -> (i32, i32, i32) {
    %c0_i32 = arith.constant 0 : i32
    %c0_i32_0 = arith.constant 0 : i32
    return %arg0, %arg1, %c0_i32 : i32, i32, i32
  }
  func.func @transform_4(%arg0: i32, %arg1: i32) -> (i32, i32, i32) {
    %c0_i32 = arith.constant 0 : i32
    %c0_i32_0 = arith.constant 0 : i32
    return %arg0, %arg1, %c0_i32 : i32, i32, i32
  }
  func.func @transform_5(%arg0: i32, %arg1: i32) -> (i32, i32, i32) {
    %c0_i32 = arith.constant 0 : i32
    %c0_i32_0 = arith.constant 0 : i32
    return %arg0, %arg1, %c0_i32 : i32, i32, i32
  }
  func.func @transform_6(%arg0: i32, %arg1: i32) -> (i32, i32, i32) {
    %c0_i32 = arith.constant 0 : i32
    %c0_i32_0 = arith.constant 0 : i32
    return %arg0, %arg1, %c0_i32 : i32, i32, i32
  }
}

</mosaic_0001>

<bundles_post_ra>
// kernel: tpu_custom_call.1
= control target key start
LH: loop header
LB: loop body
LE: loop exit
PB: predicated region body
PF: predicated region fallthrough
CT: control target
= control target key end

     0   :  { %s6509_s0 = inlined_call_operand.hbm [shape: bf16[2,8,640], index: 0, kind: input, shape index: {}]   ;;  %s6510_s1 = inlined_call_operand.hbm [shape: bf16[640,1536], index: 1, kind: input, shape index: {}]   ;;  %s6511_s2 = inlined_call_operand.hbm [shape: f32[1,1536], index: 2, kind: input, shape index: {}]   ;;  %s6512_s3 = inlined_call_operand.hbm [shape: f32[2,8,384], index: 3, kind: output, shape index: {0}]   ;;  %s6513_s4 = inlined_call_operand.hbm [shape: f32[2,8,512], index: 4, kind: output, shape index: {1}]   ;;  %s6514_s5 = inlined_call_operand.hbm [shape: f32[2,8,512], index: 5, kind: output, shape index: {2}]   ;;  %s6515_s6 = inlined_call_operand.hbm [shape: f32[2,8,128], index: 6, kind: output, shape index: {3}]  }
   0x1   :  { %6521 = sst [smem:[#allocation19_spill]] %s6509_s0 }
   0x2   :  { %6522 = sst [smem:[#allocation20_spill]] %s6510_s1 }
   0x3   :  { %12 = vsyncpa [#allocation3], 0 }
   0x4   :  { %14 = vsyncpa [#allocation3 + $0x1], 0 }
   0x5   :  { %15 = vsyncpa [#allocation6], 0 }
   0x6   :  { %16 = vsyncpa [#allocation4], 0 }
   0x7   :  { %18 = vsyncpa [#allocation4 + $0x1], 0 }
   0x8   :  { %19 = vsyncpa [#allocation10], 0 }
   0x9   :  { %21 = vsyncpa [#allocation10 + $0x1], 0 }
   0xa   :  { %22 = vsyncpa [#allocation13], 0 }
   0xb   :  { %24 = vsyncpa [#allocation13 + $0x1], 0  ;;  %s6058_s21 = smov 0   ;;  %s6060_s22 = smov 0  }
   0xc   :  { %s6062_s23 = smov 0   ;;  %s6064_s24 = smov 0  }
   0xd   :  { %s6066_s25 = smov 0   ;;  %s6068_s26 = smov 0  }
   0xe LB: > { %s6089_s27 = sadd.s32 4294967295, %s6011_s26   ;;  %s6517_s28 = sadd.s32 4294967294, %s6011_s26   ;;  %s6011_s26 = sphi %s6068_s26, %s30_s26   ;;  %s6007_s25 = sphi %s6066_s25, %s6544_s25   ;;  %s6003_s24 = sphi %s6064_s24, %s6543_s24   ;;  %s5999_s23 = sphi %s6062_s23, %s6542_s23   ;;  %s5995_s22 = sphi %s6060_s22, %s6541_s22   ;;  %s5991_s21 = sphi %s6058_s21, %s6540_s21  }
   0xf   : > { %p64_p0 = scmp.ne.s32.totalorder %s5995_s22, %s5991_s21  ;;  %p6516_p1 = scmp.eq.s32.totalorder %s6089_s27, 0 }
  0x10   : > { %p138_p3 = scmp.eq.s32.totalorder %s6517_s28, 1  ;;  %p4346_p5 = scmp.ge.s32.totalorder %s6011_s26, 1 }
  0x11   : > { %p6100_p4 = por %p6516_p1, %p64_p0  ;;  %p229_p7 = scmp.lt.s32.totalorder %s6011_s26, 3 }
  0x12   : > { %p6105_p6 = por %p138_p3, %p64_p0  ;;  %s6013_s8 = smov [#allocation5]  }
  0x13   : > { %s6523_s29 = scalar_select %p6100_p4, 1, 0 }
  0x14   : > { %s6524_s30 = scalar_select %p6105_p6, 1, 0 }
  0x15   : > { %p6110_p8 = pnand %p4346_p5, %p229_p7  ;;  %s241_s9 = sshll.u32 %s6013_s8, 4  ;;  %s6114_s9 = int_to_ptr.vmem [resolvable:$true] %s241_s9 }
  0x16   : > { %s6014_s11 = smov [#allocation7]   ;;  %s6527_s1 = sld [smem:[#allocation20_spill]] }
  0x17   : > { %p4938_p9 = pneg %p6110_p8  ;;  %s255_s12 = sshll.u32 %s6014_s11, 4  ;;  %s6125_s12 = int_to_ptr.vmem [resolvable:$true] %s255_s12 }
  0x19   : > { %p6121_p11 = pnand %p4938_p9, %p6516_p1 }
  0x1b   : > { %p5749_p13 = pneg %p6121_p11 }
  0x1c   : > { %s5747_s15 = scalar_lea.hbm %s6527_s1, 61440 }
  0x1d   : > { %p5748_p12 = scmp.ne.s32.totalorder %s6527_s1, %s5747_s15  ;;  %p5754_p5 = scmp.lt.u32.totalorder %s5747_s15, %s6527_s1 }
  0x1f   : > { %p5750_p0 = pnand %p5749_p13, %p5748_p12 }
  0x21   : > { %p5751_p3 = pneg %p5750_p0 }
  0x23   : > { %p5756_p7 = pnand %p5754_p5, %p5751_p3 }
  0x25   : > { %5759 = shalt.err (!%p5756_p7)
}
  0x26   : > { %s5760_s20 = scalar_lea.vmem %s6114_s9, 61440  ;;  %p5768_p2 = scmp.lt.s32.totalorder %s6114_s9, %s6114_s9 }
  0x27   : > { %p5761_p9 = scmp.ne.s32.totalorder %s6114_s9, %s5760_s20  ;;  %p5769_p12 = scmp.lt.s32.totalorder %s5760_s20, %s5760_s20 }
  0x29   : > { %p5763_p10 = pnand %p5761_p9, %p5749_p13  ;;  %p5770_p0 = por %p5769_p12, %p5768_p2 }
  0x2b   : > { %p5764_p1 = pneg %p5763_p10 }
  0x2d   : > { %p5771_p6 = pnand %p5770_p0, %p5764_p1 }
  0x2f   : > { %5774 = shalt.err (!%p5771_p6)
}
  0x30   : > { %s6015_s8 = smov 768   ;;  %s6016_s11 = smov 48  }
  0x31   : > { %4941 = dma.hbm_to_vmem [thread:$0]  (!%p6121_p11), %s6527_s1, 61440, %s6114_s9, [#allocation6], %s6015_s8, %s6015_s8, %s6016_s11  }
  0x32   : > { %s5775_s17 = scalar_lea.hbm %s6511_s2, 192 }
  0x33   : > { %p5776_p2 = scmp.ne.s32.totalorder %s6511_s2, %s5775_s17  ;;  %p5782_p10 = scmp.lt.u32.totalorder %s5775_s17, %s6511_s2 }
  0x35   : > { %p5778_p1 = pnand %p5776_p2, %p5749_p13 }
  0x37   : > { %p5779_p6 = pneg %p5778_p1 }
  0x39   : > { %p5784_p3 = pnand %p5782_p10, %p5779_p6 }
  0x3b   : > { %5787 = shalt.err (!%p5784_p3)
}
  0x3c   : > { %s5788_s9 = scalar_lea.vmem %s6125_s12, 192  ;;  %p5796_p12 = scmp.lt.s32.totalorder %s6125_s12, %s6125_s12 }
  0x3d   : > { %p5789_p5 = scmp.ne.s32.totalorder %s6125_s12, %s5788_s9  ;;  %p5797_p0 = scmp.lt.s32.totalorder %s5788_s9, %s5788_s9 }
  0x3f   : > { %p5791_p7 = pnand %p5789_p5, %p5749_p13  ;;  %p5798_p2 = por %p5797_p0, %p5796_p12 }
  0x41   : > { %p5792_p9 = pneg %p5791_p7 }
  0x43   : > { %p5799_p1 = pnand %p5798_p2, %p5792_p9 }
  0x45   : > { %5802 = shalt.err (!%p5799_p1)
}
  0x46   : > { %4944 = dma.hbm_to_vmem [thread:$0]  (!%p6121_p11), %s6511_s2, 192, %s6125_s12, [#allocation6]  }
  0x47   : > { %s42_s11 = sadd.s32 1, %s6007_s25  ;;  %s51_s13 = sadd.s32 1, %s5999_s23 }
  0x48   : > { %p44_p13 = scmp.ge.s32.totalorder %s42_s11, 2  ;;  %p58_p6 = scmp.ne.s32.totalorder %s5999_s23, %s5995_s22 }
  0x49   : > { %p59_p10 = scmp.eq.s32.totalorder %s6011_s26, 0  ;;  %p4964_p3 = scmp.lt.s32.totalorder %s6011_s26, 2 }
  0x4a   : > { %s6546_s11 = smov (%p44_p13, %s42_s11), 0  ;;  %p6528_p7 = scmp.eq.s32.totalorder %s6089_s27, 1 }
  0x4b   : > { %p60_p5 = por %p59_p10, %p58_p6  ;;  %s46_s14 = ssub.s32 %s6007_s25, %s6546_s11 }
  0x4c   : > { %p6189_p9 = por %p6528_p7, %p58_p6  ;;  %s266_s15 = sand.u32 1, %s5999_s23  }
  0x4d   : > { %p49_p12 = scmp.eq.s32.totalorder %s46_s14, 0  ;;  %s4915_s12 = smul.u32 20, %s266_s15 }
  0x4e   : > { %s6529_s10 = scalar_select %p6189_p9, 1, 0 }
  0x4f   : > { %p6196_p11 = pnand %p4964_p3, %p60_p5  ;;  %s4916_s18 = smul.u32 320, %s6007_s25 }
  0x50   : > { %s6201_s17 = scalar_select %p49_p12, %s5999_s23, %s51_s13  }
  0x51   : > { %s270_s19 = scalar_lea.vmem [#allocation2], %s4915_s12  ;;  %s6531_s0 = sld [smem:[#allocation19_spill]] }
  0x52   : > { %s280_s20 = sshll.u32 %s270_s19, 4  ;;  %s267_s14 = scalar_lea.sflag [#allocation3], %s266_s15  ;;  %s6209_s20 = int_to_ptr.vmem [resolvable:$true] %s280_s20 }
  0x53   : > { %p5805_p2 = pneg %p6196_p11 }
  0x57   : > { %s6207_s8 = scalar_lea.hbm %s6531_s0, %s4916_s18  ;;  %s5808_s18 = scalar_lea.hbm %s6531_s0, 640 }
  0x58   : > { %s5803_s1 = scalar_lea.hbm %s6207_s8, 320  ;;  %p5809_p6 = scmp.lt.u32.totalorder %s6207_s8, %s6531_s0 }
  0x59   : > { %p5804_p0 = scmp.ne.s32.totalorder %s6207_s8, %s5803_s1  ;;  %p5810_p10 = scmp.lt.u32.totalorder %s5808_s18, %s5803_s1 }
  0x5a   : > { %p5812_p5 = scmp.lt.u32.totalorder %s5803_s1, %s6207_s8 }
  0x5b   : > { %p5806_p1 = pnand %p5805_p2, %p5804_p0  ;;  %p5811_p3 = por %p5810_p10, %p5809_p6 }
  0x5d   : > { %p5807_p13 = pneg %p5806_p1  ;;  %p5813_p7 = por %p5812_p5, %p5811_p3 }
  0x5f   : > { %p5814_p12 = pnand %p5813_p7, %p5807_p13 }
  0x61   : > { %5817 = shalt.err (!%p5814_p12)
}
  0x62   : > { %s5818_s15 = scalar_lea.vmem %s6209_s20, 320  ;;  %s6017_s28 = smov [#allocation2]  }
  0x63   : > { %p5819_p0 = scmp.ne.s32.totalorder %s6209_s20, %s5818_s15  ;;  %s5823_s13 = sshll.u32 %s6017_s28, 4  ;;  %s5824_s13 = int_to_ptr.vmem [resolvable:$false] %s5823_s13 }
  0x64   : > { %s5825_s12 = scalar_lea.vmem %s5824_s13, 640  ;;  %p5826_p4 = scmp.lt.s32.totalorder %s6209_s20, %s5824_s13 }
  0x65   : > { %p5821_p1 = pnand %p5819_p0, %p5805_p2  ;;  %p5827_p6 = scmp.lt.s32.totalorder %s5825_s12, %s5818_s15 }
  0x67   : > { %p5822_p9 = pneg %p5821_p1  ;;  %p5828_p10 = por %p5827_p6, %p5826_p4 }
  0x69   : > { %p5829_p3 = pnand %p5828_p10, %p5822_p9 }
  0x6b   : > { %5832 = shalt.err (!%p5829_p3)
}
  0x6c   : > { %4948 = dma.hbm_to_vmem [thread:$0]  (!%p6196_p11), %s6207_s8, 320, %s6209_s20, %s267_s14  }
  0x6d   : > { %289 = sbr.rel (%p6110_p8) target bundleno = 853 (0x355), region = 32  ;;  %s6239_s1 = sand.u32 (!%p6110_p8), 1, %s5995_s22  }
  0x6e   : > { %s4917_s18 = smul.u32 (!%p6110_p8), 20, %s6239_s1  ;;  %s292_s19 = scalar_lea.sflag (!%p6110_p8), [#allocation3], %s6239_s1 }
  0x6f   : > { %p6532_p4 = scmp.ne.s32.totalorder (!%p6110_p8), %s6523_s29, 0 }
  0x70   : > { %s6243_s9 = scalar_lea.vmem (!%p6110_p8), [#allocation2], %s4917_s18 }
  0x74   : > { %5970 = dma.done.wait (%p6532_p4), %s292_s19, 320  }
  0x75   : > { %5972 = vsyncadd (%p6532_p4), %s292_s19, 4294966976  ;;  %p6533_p9 = scmp.eq.s32.totalorder %s6089_s27, 0 }
  0x77   : > { %5974 = dma.done.wait (%p6533_p9), [#allocation6], 61632   ;;  %p6534_p8 = pmov %p6533_p9 }
  0x78   : > { %v5021_v0 = vld [vmem:[#allocation5 + $0x4] ss:$48 sps:$4 sm:$0xff]   ;;  %v5023_v1 = vld [vmem:[#allocation5 + $0xc] ss:$48 sps:$4 sm:$0xff]   ;;  %v5025_v2 = vld [vmem:[#allocation5] ss:$48 sps:$4 sm:$0xff]  }
  0x79   : > { %5976 = vsyncadd (%p6534_p8), [#allocation6], 4294905664  ;;  %3313 = vmatprep.subr.bf16.mxu0 %v5021_v0  ;;  %v5026_v3 = vld [vmem:[#allocation5 + $0x8] ss:$48 sps:$4 sm:$0xff]   ;;  %3436 = vmatprep.subr.bf16.mxu1 %v5023_v1  ;;  %v5027_v4 = vld [vmem:[#allocation5 + $0x64] ss:$48 sps:$4 sm:$0xff]  }
  0x7a   : > { %3314 = vmatpush1.bf16.msra.mxu0 %v5025_v2  ;;  %3437 = vmatpush1.bf16.msra.mxu1 %v5026_v3  ;;  %v5029_v5 = vld [vmem:[#allocation5 + $0x6c] ss:$48 sps:$4 sm:$0xff]   ;;  %v5031_v6 = vld [vmem:[#allocation5 + $0x60] ss:$48 sps:$4 sm:$0xff]   ;;  %v5032_v7 = vld [vmem:[#allocation5 + $0x68] ss:$48 sps:$4 sm:$0xff]  }
  0x7b   : > { %3315 = vmatprep.subr.bf16.mxu0 %v5027_v4  ;;  %3438 = vmatprep.subr.bf16.mxu1 %v5029_v5  ;;  %v5033_v8 = vld [vmem:[#allocation5 + $0xc4] ss:$48 sps:$4 sm:$0xff]   ;;  %v5035_v9 = vld [vmem:[#allocation5 + $0xcc] ss:$48 sps:$4 sm:$0xff]   ;;  %v5037_v10 = vld [vmem:[#allocation5 + $0xc0] ss:$48 sps:$4 sm:$0xff]  }
  0x7c   : > { %v5038_v11 = vld [vmem:[#allocation5 + $0xc8] ss:$48 sps:$4 sm:$0xff]   ;;  %v5039_v12 = vld [vmem:[#allocation5 + $0x124] ss:$48 sps:$4 sm:$0xff]   ;;  %v5041_v13 = vld [vmem:[#allocation5 + $0x12c] ss:$48 sps:$4 sm:$0xff]  }
  0x7d   : > { %v5043_v14 = vld [vmem:[#allocation5 + $0x120] ss:$48 sps:$4 sm:$0xff]   ;;  %v5044_v15 = vld [vmem:[#allocation5 + $0x128] ss:$48 sps:$4 sm:$0xff]   ;;  %v5045_v16 = vld [vmem:[#allocation5 + $0x184] ss:$48 sps:$4 sm:$0xff]  }
  0x7e   : > { %3316 = vmatpush1.bf16.msra.mxu0 %v5031_v6  ;;  %3439 = vmatpush1.bf16.msra.mxu1 %v5032_v7  ;;  %v5047_v17 = vld [vmem:[#allocation5 + $0x18c] ss:$48 sps:$4 sm:$0xff]   ;;  %v5049_v18 = vld [vmem:[#allocation5 + $0x180] ss:$48 sps:$4 sm:$0xff]   ;;  %v5050_v19 = vld [vmem:[#allocation5 + $0x188] ss:$48 sps:$4 sm:$0xff]  }
  0x7f   : > { %3317 = vmatprep.subr.bf16.mxu0 %v5033_v8  ;;  %3440 = vmatprep.subr.bf16.mxu1 %v5035_v9  ;;  %v5051_v20 = vld [vmem:[#allocation5 + $0x1e4] ss:$48 sps:$4 sm:$0xff]   ;;  %v5053_v21 = vld [vmem:[#allocation5 + $0x1ec] ss:$48 sps:$4 sm:$0xff]   ;;  %v5055_v22 = vld [vmem:[#allocation5 + $0x1e0] ss:$48 sps:$4 sm:$0xff]  }
  0x80   : > { %v5056_v23 = vld [vmem:[#allocation5 + $0x1e8] ss:$48 sps:$4 sm:$0xff]   ;;  %v5057_v24 = vld [vmem:[#allocation5 + $0x244] ss:$48 sps:$4 sm:$0xff]   ;;  %v5059_v25 = vld [vmem:[#allocation5 + $0x24c] ss:$48 sps:$4 sm:$0xff]  }
  0x81   : > { %v5061_v26 = vld [vmem:[#allocation5 + $0x240] ss:$48 sps:$4 sm:$0xff]   ;;  %v5062_v27 = vld [vmem:[#allocation5 + $0x248] ss:$48 sps:$4 sm:$0xff]   ;;  %v5063_v28 = vld [vmem:[#allocation5 + $0x2a4] ss:$48 sps:$4 sm:$0xff]  }
  0x82   : > { %3318 = vmatpush1.bf16.msra.mxu0 %v5037_v10  ;;  %3441 = vmatpush1.bf16.msra.mxu1 %v5038_v11  ;;  %v5065_v29 = vld [vmem:[#allocation5 + $0x2ac] ss:$48 sps:$4 sm:$0xff]   ;;  %v5067_v30 = vld [vmem:[#allocation5 + $0x2a0] ss:$48 sps:$4 sm:$0xff]   ;;  %v5068_v31 = vld [vmem:[#allocation5 + $0x2a8] ss:$48 sps:$4 sm:$0xff]  }
  0x83   : > { %3319 = vmatprep.subr.bf16.mxu0 %v5039_v12  ;;  %3442 = vmatprep.subr.bf16.mxu1 %v5041_v13  ;;  %v5069_v32 = vld [vmem:[#allocation5 + $0x304] ss:$48 sps:$4 sm:$0xff]   ;;  %v5071_v33 = vld [vmem:[#allocation5 + $0x30c] ss:$48 sps:$4 sm:$0xff]   ;;  %v5073_v34 = vld [vmem:[#allocation5 + $0x300] ss:$48 sps:$4 sm:$0xff]  }
  0x84   : > { %v5074_v35 = vld [vmem:[#allocation5 + $0x308] ss:$48 sps:$4 sm:$0xff]   ;;  %v5075_v36 = vld [vmem:[#allocation5 + $0x364] ss:$48 sps:$4 sm:$0xff]   ;;  %v5077_v37 = vld [vmem:[#allocation5 + $0x36c] ss:$48 sps:$4 sm:$0xff]  }
  0x85   : > { %v5079_v38 = vld [vmem:[#allocation5 + $0x360] ss:$48 sps:$4 sm:$0xff]   ;;  %v5080_v39 = vld [vmem:[#allocation5 + $0x368] ss:$48 sps:$4 sm:$0xff]   ;;  %v5081_v40 = vld [vmem:[#allocation5 + $0x3c4] ss:$48 sps:$4 sm:$0xff]  }
  0x86   : > { %3320 = vmatpush1.bf16.msra.mxu0 %v5043_v14  ;;  %3443 = vmatpush1.bf16.msra.mxu1 %v5044_v15  ;;  %v5083_v41 = vld [vmem:[#allocation5 + $0x3cc] ss:$48 sps:$4 sm:$0xff]   ;;  %v5085_v42 = vld [vmem:[#allocation5 + $0x3c0] ss:$48 sps:$4 sm:$0xff]   ;;  %v5086_v43 = vld [vmem:[#allocation5 + $0x3c8] ss:$48 sps:$4 sm:$0xff]  }
  0x87   : > { %3321 = vmatprep.subr.bf16.mxu0 %v5045_v16  ;;  %3444 = vmatprep.subr.bf16.mxu1 %v5047_v17  ;;  %v5087_v44 = vld [vmem:[#allocation5 + $0x424] ss:$48 sps:$4 sm:$0xff]   ;;  %v5089_v45 = vld [vmem:[#allocation5 + $0x42c] ss:$48 sps:$4 sm:$0xff]   ;;  %v5091_v47 = vld [vmem:[#allocation5 + $0x420] ss:$48 sps:$4 sm:$0xff]  }
  0x88   : > { %v348_v46 = vld [vmem:[%s6243_s9] sm:$0xff]  ;;  %v5093_v50 = vld [vmem:[#allocation5 + $0x484] ss:$48 sps:$4 sm:$0xff]   ;;  %s4918_s29 = smul.u32 24, %s6239_s1  ;;  %s4354_s7 = sshll.u32 %s6239_s1, 5 }
  0x89   : > { %v6254_v48 = vcombine.high %v348_v46, %v348_v46  ;;  %v5092_v49 = vld [vmem:[#allocation5 + $0x428] ss:$48 sps:$4 sm:$0xff]   ;;  %v5095_v51 = vld [vmem:[#allocation5 + $0x48c] ss:$48 sps:$4 sm:$0xff]   ;;  %v5097_v52 = vld [vmem:[#allocation5 + $0x480] ss:$48 sps:$4 sm:$0xff]   ;;  %v6258_v5 = vcombine.low %v348_v46, %v348_v46 }
  0x8a   : > { %3322 = vmatpush1.bf16.msra.mxu0 %v5049_v18  ;;  %3445 = vmatpush1.bf16.msra.mxu1 %v5050_v19  ;;  %v5098_v53 = vld [vmem:[#allocation5 + $0x488] ss:$48 sps:$4 sm:$0xff]   ;;  %v5099_v54 = vld [vmem:[#allocation5 + $0x4e4] ss:$48 sps:$4 sm:$0xff]   ;;  %v5101_v55 = vld [vmem:[#allocation5 + $0x4ec] ss:$48 sps:$4 sm:$0xff]  }
  0x8b   : > { %3323 = vmatprep.subr.bf16.mxu0 %v5051_v20  ;;  %3446 = vmatprep.subr.bf16.mxu1 %v5053_v21  ;;  %v5103_v56 = vld [vmem:[#allocation5 + $0x4e0] ss:$48 sps:$4 sm:$0xff]   ;;  %v5104_v57 = vld [vmem:[#allocation5 + $0x4e8] ss:$48 sps:$4 sm:$0xff]   ;;  %v5105_v58 = vld [vmem:[#allocation5 + $0x544] ss:$48 sps:$4 sm:$0xff]  }
  0x8c   : > { %3345 = vmatprep.mubr.bf16.mxu0 %v6254_v48  ;;  %3468 = vmatprep.mubr.bf16.mxu1 %v6254_v48  ;;  %v5107_v59 = vld [vmem:[#allocation5 + $0x54c] ss:$48 sps:$4 sm:$0xff]   ;;  %v5109_v60 = vld [vmem:[#allocation5 + $0x540] ss:$48 sps:$4 sm:$0xff]   ;;  %v5110_v61 = vld [vmem:[#allocation5 + $0x548] ss:$48 sps:$4 sm:$0xff]  }
  0x8d   : > { %v5111_v62 = vld [vmem:[#allocation5 + $0x5a4] ss:$48 sps:$4 sm:$0xff]   ;;  %v5113_v63 = vld [vmem:[#allocation5 + $0x5ac] ss:$48 sps:$4 sm:$0xff]   ;;  %v5115_v0 = vld [vmem:[#allocation5 + $0x5a0] ss:$48 sps:$4 sm:$0xff]  }
  0x8e   : > { %3324 = vmatpush1.bf16.msra.mxu0 %v5055_v22  ;;  %3447 = vmatpush1.bf16.msra.mxu1 %v5056_v23  ;;  %v5116_v1 = vld [vmem:[#allocation5 + $0x5a8] ss:$48 sps:$4 sm:$0xff]   ;;  %v5120_v2 = vld [vmem:[#allocation5 + $0x604] ss:$48 sps:$4 sm:$0xff]   ;;  %v5123_v3 = vld [vmem:[#allocation5 + $0x60c] ss:$48 sps:$4 sm:$0xff]  }
  0x8f   : > { %3325 = vmatprep.subr.bf16.mxu0 %v5057_v24  ;;  %3448 = vmatprep.subr.bf16.mxu1 %v5059_v25  ;;  %v5118_v4 = vld [vmem:[#allocation5 + $0x600] ss:$48 sps:$4 sm:$0xff]   ;;  %v5121_v6 = vld [vmem:[#allocation5 + $0x608] ss:$48 sps:$4 sm:$0xff]   ;;  %v5127_v7 = vld [vmem:[#allocation5 + $0x664] ss:$48 sps:$4 sm:$0xff]  }
  0x90   : > { %v5130_v8 = vld [vmem:[#allocation5 + $0x66c] ss:$48 sps:$4 sm:$0xff]   ;;  %v5125_v9 = vld [vmem:[#allocation5 + $0x660] ss:$48 sps:$4 sm:$0xff]   ;;  %v5128_v10 = vld [vmem:[#allocation5 + $0x668] ss:$48 sps:$4 sm:$0xff]  }
  0x91   : > { %v5133_v11 = vld [vmem:[#allocation5 + $0x6c4] ss:$48 sps:$4 sm:$0xff]   ;;  %v5136_v12 = vld [vmem:[#allocation5 + $0x6cc] ss:$48 sps:$4 sm:$0xff]   ;;  %v5131_v13 = vld [vmem:[#allocation5 + $0x6c0] ss:$48 sps:$4 sm:$0xff]  }
  0x92   : > { %3326 = vmatpush1.bf16.msra.mxu0 %v5061_v26  ;;  %3449 = vmatpush1.bf16.msra.mxu1 %v5062_v27  ;;  %v5134_v14 = vld [vmem:[#allocation5 + $0x6c8] ss:$48 sps:$4 sm:$0xff]   ;;  %v5139_v15 = vld [vmem:[#allocation5 + $0x724] ss:$48 sps:$4 sm:$0xff]   ;;  %v5142_v16 = vld [vmem:[#allocation5 + $0x72c] ss:$48 sps:$4 sm:$0xff]  }
  0x93   : > { %3327 = vmatprep.subr.bf16.mxu0 %v5063_v28  ;;  %3450 = vmatprep.subr.bf16.mxu1 %v5065_v29  ;;  %v5137_v17 = vld [vmem:[#allocation5 + $0x720] ss:$48 sps:$4 sm:$0xff]   ;;  %v5140_v18 = vld [vmem:[#allocation5 + $0x728] ss:$48 sps:$4 sm:$0xff]   ;;  %v5145_v19 = vld [vmem:[#allocation5 + $0x784] ss:$48 sps:$4 sm:$0xff]  }
  0x94   : > { %v5148_v20 = vld [vmem:[#allocation5 + $0x78c] ss:$48 sps:$4 sm:$0xff]   ;;  %v5143_v21 = vld [vmem:[#allocation5 + $0x780] ss:$48 sps:$4 sm:$0xff]   ;;  %v5146_v22 = vld [vmem:[#allocation5 + $0x788] ss:$48 sps:$4 sm:$0xff]  }
  0x95   : > { %v5151_v23 = vld [vmem:[#allocation5 + $0x7e4] ss:$48 sps:$4 sm:$0xff]   ;;  %v5154_v24 = vld [vmem:[#allocation5 + $0x7ec] ss:$48 sps:$4 sm:$0xff]   ;;  %v5149_v25 = vld [vmem:[#allocation5 + $0x7e0] ss:$48 sps:$4 sm:$0xff]  }
  0x96   : > { %3328 = vmatpush1.bf16.msra.mxu0 %v5067_v30  ;;  %3451 = vmatpush1.bf16.msra.mxu1 %v5068_v31  ;;  %v5152_v26 = vld [vmem:[#allocation5 + $0x7e8] ss:$48 sps:$4 sm:$0xff]   ;;  %v5157_v27 = vld [vmem:[#allocation5 + $0x844] ss:$48 sps:$4 sm:$0xff]   ;;  %v5160_v28 = vld [vmem:[#allocation5 + $0x84c] ss:$48 sps:$4 sm:$0xff]  }
  0x97   : > { %3329 = vmatprep.subr.bf16.mxu0 %v5069_v32  ;;  %3452 = vmatprep.subr.bf16.mxu1 %v5071_v33  ;;  %v6263_v29 = vld [vmem:[%s6243_s9 + $0x8] sm:$0xff]  ;;  %v5184_v46 = vld [vmem:[#allocation5 + $0x9cc] ss:$48 sps:$4 sm:$0xff]   ;;  %s6319_s16 = scalar_lea.vmem [#allocation8], %s4918_s29  ;;  %s6326_s20 = scalar_lea.vmem [#allocation9], %s4354_s7 }
  0x98   : > { %v6267_v30 = vcombine.high %v6263_v29, %v6263_v29  ;;  %v5155_v31 = vld [vmem:[#allocation5 + $0x840] ss:$48 sps:$4 sm:$0xff]   ;;  %v5158_v32 = vld [vmem:[#allocation5 + $0x848] ss:$48 sps:$4 sm:$0xff]   ;;  %v5163_v33 = vld [vmem:[#allocation5 + $0x8a4] ss:$48 sps:$4 sm:$0xff]  }
  0x99   : > { %s6352_s8 = scalar_lea.vmem [#allocation11], %s4354_s7  ;;  %s4068_s14 = sand.u32 1, %s6089_s27  }
  0x9a   : > { %3330 = vmatpush1.bf16.msra.mxu0 %v5073_v34  ;;  %3453 = vmatpush1.bf16.msra.mxu1 %v5074_v35  ;;  %v5166_v34 = vld [vmem:[#allocation5 + $0x8ac] ss:$48 sps:$4 sm:$0xff]   ;;  %v5161_v35 = vld [vmem:[#allocation5 + $0x8a0] ss:$48 sps:$4 sm:$0xff]   ;;  %s6520_s15 = sshll.u32 %s6003_s24, 9  ;;  %s4111_s18 = sshll.u32 %s6326_s20, 4  ;;  %s4112_s18 = int_to_ptr.vmem [resolvable:$true] %s4111_s18 }
  0x9b   : > { %3331 = vmatprep.subr.bf16.mxu0 %v5075_v36  ;;  %3454 = vmatprep.subr.bf16.mxu1 %v5077_v37  ;;  %v5164_v36 = vld [vmem:[#allocation5 + $0x8a8] ss:$48 sps:$4 sm:$0xff]   ;;  %v5169_v37 = vld [vmem:[#allocation5 + $0x904] ss:$48 sps:$4 sm:$0xff]   ;;  %s6362_s12 = scalar_lea.hbm %s6513_s4, %s6520_s15  ;;  %s6365_s19 = scalar_lea.sflag [#allocation10], %s4068_s14 }
  0x9c   : > { %p6535_p2 = scmp.ne.s32.totalorder %s6529_s10, 0  ;;  %s6019_s29 = smov [#allocation9]  }
  0x9d   : > { %s5837_s7 = sshll.u32 %s6019_s29, 4  ;;  %s5838_s7 = int_to_ptr.vmem [resolvable:$false] %s5837_s7 }
  0x9e   : > { %3332 = vmatpush1.bf16.msra.mxu0 %v5079_v38  ;;  %3455 = vmatpush1.bf16.msra.mxu1 %v5080_v39  ;;  %v5172_v38 = vld [vmem:[#allocation5 + $0x90c] ss:$48 sps:$4 sm:$0xff]   ;;  %v5167_v39 = vld [vmem:[#allocation5 + $0x900] ss:$48 sps:$4 sm:$0xff]   ;;  %s5839_s27 = scalar_lea.vmem %s5838_s7, 1024  ;;  %p5840_p7 = scmp.lt.s32.totalorder %s4112_s18, %s5838_s7 }
  0x9f   : > { %3333 = vmatprep.subr.bf16.mxu0 %v5081_v40  ;;  %3456 = vmatprep.subr.bf16.mxu1 %v5083_v41  ;;  %v5170_v40 = vld [vmem:[#allocation5 + $0x908] ss:$48 sps:$4 sm:$0xff]   ;;  %v5175_v41 = vld [vmem:[#allocation5 + $0x964] ss:$48 sps:$4 sm:$0xff]  }
  0xa2   : > { %3334 = vmatpush1.bf16.msra.mxu0 %v5085_v42  ;;  %3457 = vmatpush1.bf16.msra.mxu1 %v5086_v43  ;;  %v5178_v42 = vld [vmem:[#allocation5 + $0x96c] ss:$48 sps:$4 sm:$0xff]   ;;  %v5173_v43 = vld [vmem:[#allocation5 + $0x960] ss:$48 sps:$4 sm:$0xff]  }
  0xa3   : > { %3335 = vmatprep.subr.bf16.mxu0 %v5087_v44  ;;  %3458 = vmatprep.subr.bf16.mxu1 %v5089_v45  ;;  %v5176_v44 = vld [vmem:[#allocation5 + $0x968] ss:$48 sps:$4 sm:$0xff]   ;;  %v5181_v45 = vld [vmem:[#allocation5 + $0x9c4] ss:$48 sps:$4 sm:$0xff]  }
  0xa6   : > { %3336 = vmatpush1.bf16.msra.mxu0 %v5091_v47  ;;  %3459 = vmatpush1.bf16.msra.mxu1 %v5092_v49  ;;  %v5179_v47 = vld [vmem:[#allocation5 + $0x9c0] ss:$48 sps:$4 sm:$0xff]   ;;  %v5182_v49 = vld [vmem:[#allocation5 + $0x9c8] ss:$48 sps:$4 sm:$0xff]  }
  0xa7   : > { %3337 = vmatprep.subr.bf16.mxu0 %v5093_v50  ;;  %3460 = vmatprep.subr.bf16.mxu1 %v5095_v51  ;;  %v5187_v50 = vld [vmem:[#allocation5 + $0xa24] ss:$48 sps:$4 sm:$0xff]   ;;  %v5190_v51 = vld [vmem:[#allocation5 + $0xa2c] ss:$48 sps:$4 sm:$0xff]  }
  0xaa   : > { %3338 = vmatpush1.bf16.msra.mxu0 %v5097_v52  ;;  %3461 = vmatpush1.bf16.msra.mxu1 %v5098_v53  ;;  %v5185_v52 = vld [vmem:[#allocation5 + $0xa20] ss:$48 sps:$4 sm:$0xff]   ;;  %v5188_v53 = vld [vmem:[#allocation5 + $0xa28] ss:$48 sps:$4 sm:$0xff]  }
  0xab   : > { %3339 = vmatprep.subr.bf16.mxu0 %v5099_v54  ;;  %3462 = vmatprep.subr.bf16.mxu1 %v5101_v55  ;;  %v5193_v54 = vld [vmem:[#allocation5 + $0xa84] ss:$48 sps:$4 sm:$0xff]   ;;  %v5196_v55 = vld [vmem:[#allocation5 + $0xa8c] ss:$48 sps:$4 sm:$0xff]  }
  0xae   : > { %3340 = vmatpush1.bf16.msra.mxu0 %v5103_v56  ;;  %3463 = vmatpush1.bf16.msra.mxu1 %v5104_v57  ;;  %v5191_v56 = vld [vmem:[#allocation5 + $0xa80] ss:$48 sps:$4 sm:$0xff]   ;;  %v5194_v57 = vld [vmem:[#allocation5 + $0xa88] ss:$48 sps:$4 sm:$0xff]  }
  0xaf   : > { %3341 = vmatprep.subr.bf16.mxu0 %v5105_v58  ;;  %3464 = vmatprep.subr.bf16.mxu1 %v5107_v59  ;;  %v5199_v58 = vld [vmem:[#allocation5 + $0xae4] ss:$48 sps:$4 sm:$0xff]   ;;  %v5202_v59 = vld [vmem:[#allocation5 + $0xaec] ss:$48 sps:$4 sm:$0xff]  }
  0xb2   : > { %3342 = vmatpush1.bf16.msra.mxu0 %v5109_v60  ;;  %3465 = vmatpush1.bf16.msra.mxu1 %v5110_v61  ;;  %v5197_v60 = vld [vmem:[#allocation5 + $0xae0] ss:$48 sps:$4 sm:$0xff]   ;;  %v5200_v61 = vld [vmem:[#allocation5 + $0xae8] ss:$48 sps:$4 sm:$0xff]  }
  0xb3   : > { %3343 = vmatprep.subr.bf16.mxu0 %v5111_v62  ;;  %3466 = vmatprep.subr.bf16.mxu1 %v5113_v63  ;;  %v5205_v62 = vld [vmem:[#allocation5 + $0xb44] ss:$48 sps:$4 sm:$0xff]   ;;  %v5208_v63 = vld [vmem:[#allocation5 + $0xb4c] ss:$48 sps:$4 sm:$0xff]  }
  0xb6   : > { %3344 = vmatpush1.bf16.msra.mxu0 %v5115_v0  ;;  %3467 = vmatpush1.bf16.msra.mxu1 %v5116_v1  ;;  %v5203_v0 = vld [vmem:[#allocation5 + $0xb40] ss:$48 sps:$4 sm:$0xff]   ;;  %v5206_v1 = vld [vmem:[#allocation5 + $0xb48] ss:$48 sps:$4 sm:$0xff]  }
  0xb7   : > { %3354 = vmatprep.subr.bf16.mxu0 %v5120_v2  ;;  %3477 = vmatprep.subr.bf16.mxu1 %v5123_v3  ;;  %v5211_v2 = vld [vmem:[#allocation5 + $0xba4] ss:$48 sps:$4 sm:$0xff]   ;;  %v5214_v3 = vld [vmem:[#allocation5 + $0xbac] ss:$48 sps:$4 sm:$0xff]  }
  0xb9   : > { %3346 = vmatmul.mubr.bf16.vlgmr.msra.gmra.mrb[0].mxu0 %v6258_v5  ;;  %3469 = vmatmul.mubr.bf16.vlgmr.msra.gmra.mrb[0].mxu1 %v6258_v5 }
  0xba   : > { %3355 = vmatpush1.bf16.msra.mxu0 %v5118_v4  ;;  %3478 = vmatpush1.bf16.msra.mxu1 %v5121_v6  ;;  %v5209_v4 = vld [vmem:[#allocation5 + $0xba0] ss:$48 sps:$4 sm:$0xff]   ;;  %v5212_v6 = vld [vmem:[#allocation5 + $0xba8] ss:$48 sps:$4 sm:$0xff]  }
  0xbb   : > { %3356 = vmatprep.subr.bf16.mxu0 %v5127_v7  ;;  %3479 = vmatprep.subr.bf16.mxu1 %v5130_v8  ;;  %v5218_v7 = vld [vmem:[#allocation5 + $0xc04] ss:$48 sps:$4 sm:$0xff]   ;;  %v5221_v8 = vld [vmem:[#allocation5 + $0xc0c] ss:$48 sps:$4 sm:$0xff]  }
  0xbc   : > { %3386 = vmatprep.mubr.bf16.mxu0 %v6267_v30  ;;  %3509 = vmatprep.mubr.bf16.mxu1 %v6267_v30 }
  0xbe   : > { %3357 = vmatpush1.bf16.msra.mxu0 %v5125_v9  ;;  %3480 = vmatpush1.bf16.msra.mxu1 %v5128_v10  ;;  %v5216_v9 = vld [vmem:[#allocation5 + $0xc00] ss:$48 sps:$4 sm:$0xff]   ;;  %v5219_v10 = vld [vmem:[#allocation5 + $0xc08] ss:$48 sps:$4 sm:$0xff]  }
  0xbf   : > { %3358 = vmatprep.subr.bf16.mxu0 %v5133_v11  ;;  %3481 = vmatprep.subr.bf16.mxu1 %v5136_v12  ;;  %v6273_v11 = vcombine.low %v6263_v29, %v6263_v29  ;;  %v5225_v12 = vld [vmem:[#allocation5 + $0xc64] ss:$48 sps:$4 sm:$0xff]  }
  0xc0   : > { %v5249_v29 = vld [vmem:[#allocation5 + $0xde4] ss:$48 sps:$4 sm:$0xff]  }
  0xc2   : > { %3359 = vmatpush1.bf16.msra.mxu0 %v5131_v13  ;;  %3482 = vmatpush1.bf16.msra.mxu1 %v5134_v14  ;;  %v5228_v13 = vld [vmem:[#allocation5 + $0xc6c] ss:$48 sps:$4 sm:$0xff]   ;;  %v5223_v14 = vld [vmem:[#allocation5 + $0xc60] ss:$48 sps:$4 sm:$0xff]  }
  0xc3   : > { %3360 = vmatprep.subr.bf16.mxu0 %v5139_v15  ;;  %3483 = vmatprep.subr.bf16.mxu1 %v5142_v16  ;;  %v5226_v15 = vld [vmem:[#allocation5 + $0xc68] ss:$48 sps:$4 sm:$0xff]   ;;  %v5231_v16 = vld [vmem:[#allocation5 + $0xcc4] ss:$48 sps:$4 sm:$0xff]  }
  0xc6   : > { %3361 = vmatpush1.bf16.msra.mxu0 %v5137_v17  ;;  %3484 = vmatpush1.bf16.msra.mxu1 %v5140_v18  ;;  %v5234_v17 = vld [vmem:[#allocation5 + $0xccc] ss:$48 sps:$4 sm:$0xff]   ;;  %v6018_v18 = vmov 0  }
  0xc7   : > { %3362 = vmatprep.subr.bf16.mxu0 %v5145_v19  ;;  %3485 = vmatprep.subr.bf16.mxu1 %v5148_v20  ;;  %v5229_v19 = vld [vmem:[#allocation5 + $0xcc0] ss:$48 sps:$4 sm:$0xff]   ;;  %v5232_v20 = vld [vmem:[#allocation5 + $0xcc8] ss:$48 sps:$4 sm:$0xff]  }
  0xca   : > { %3363 = vmatpush1.bf16.msra.mxu0 %v5143_v21  ;;  %3486 = vmatpush1.bf16.msra.mxu1 %v5146_v22  ;;  %v5237_v21 = vld [vmem:[#allocation5 + $0xd24] ss:$48 sps:$4 sm:$0xff]   ;;  %v5240_v22 = vld [vmem:[#allocation5 + $0xd2c] ss:$48 sps:$4 sm:$0xff]  }
  0xcb   : > { %3364 = vmatprep.subr.bf16.mxu0 %v5151_v23  ;;  %3487 = vmatprep.subr.bf16.mxu1 %v5154_v24  ;;  %v5235_v23 = vld [vmem:[#allocation5 + $0xd20] ss:$48 sps:$4 sm:$0xff]   ;;  %v5238_v24 = vld [vmem:[#allocation5 + $0xd28] ss:$48 sps:$4 sm:$0xff]  }
  0xce   : > { %3365 = vmatpush1.bf16.msra.mxu0 %v5149_v25  ;;  %3488 = vmatpush1.bf16.msra.mxu1 %v5152_v26  ;;  %v5243_v25 = vld [vmem:[#allocation5 + $0xd84] ss:$48 sps:$4 sm:$0xff]   ;;  %v5246_v26 = vld [vmem:[#allocation5 + $0xd8c] ss:$48 sps:$4 sm:$0xff]  }
  0xcf   : > { %3366 = vmatprep.subr.bf16.mxu0 %v5157_v27  ;;  %3489 = vmatprep.subr.bf16.mxu1 %v5160_v28  ;;  %v5241_v27 = vld [vmem:[#allocation5 + $0xd80] ss:$48 sps:$4 sm:$0xff]   ;;  %v5244_v28 = vld [vmem:[#allocation5 + $0xd88] ss:$48 sps:$4 sm:$0xff]  }
  0xd2   : > { %3367 = vmatpush1.bf16.msra.mxu0 %v5155_v31  ;;  %3490 = vmatpush1.bf16.msra.mxu1 %v5158_v32  ;;  %v5252_v31 = vld [vmem:[#allocation5 + $0xdec] ss:$48 sps:$4 sm:$0xff]   ;;  %v5247_v32 = vld [vmem:[#allocation5 + $0xde0] ss:$48 sps:$4 sm:$0xff]  }
  0xd3   : > { %3368 = vmatprep.subr.bf16.mxu0 %v5163_v33  ;;  %3491 = vmatprep.subr.bf16.mxu1 %v5166_v34  ;;  %v5250_v33 = vld [vmem:[#allocation5 + $0xde8] ss:$48 sps:$4 sm:$0xff]   ;;  %v5255_v34 = vld [vmem:[#allocation5 + $0xe44] ss:$48 sps:$4 sm:$0xff]  }
  0xd6   : > { %3369 = vmatpush1.bf16.msra.mxu0 %v5161_v35  ;;  %3492 = vmatpush1.bf16.msra.mxu1 %v5164_v36  ;;  %v5258_v35 = vld [vmem:[#allocation5 + $0xe4c] ss:$48 sps:$4 sm:$0xff]   ;;  %v5253_v36 = vld [vmem:[#allocation5 + $0xe40] ss:$48 sps:$4 sm:$0xff]  }
  0xd7   : > { %3370 = vmatprep.subr.bf16.mxu0 %v5169_v37  ;;  %3493 = vmatprep.subr.bf16.mxu1 %v5172_v38  ;;  %v5256_v37 = vld [vmem:[#allocation5 + $0xe48] ss:$48 sps:$4 sm:$0xff]   ;;  %v5261_v38 = vld [vmem:[#allocation5 + $0xea4] ss:$48 sps:$4 sm:$0xff]  }
  0xda   : > { %3371 = vmatpush1.bf16.msra.mxu0 %v5167_v39  ;;  %3494 = vmatpush1.bf16.msra.mxu1 %v5170_v40  ;;  %v5264_v39 = vld [vmem:[#allocation5 + $0xeac] ss:$48 sps:$4 sm:$0xff]   ;;  %v5259_v40 = vld [vmem:[#allocation5 + $0xea0] ss:$48 sps:$4 sm:$0xff]  }
  0xdb   : > { %3372 = vmatprep.subr.bf16.mxu0 %v5175_v41  ;;  %3495 = vmatprep.subr.bf16.mxu1 %v5178_v42  ;;  %v5262_v41 = vld [vmem:[#allocation5 + $0xea8] ss:$48 sps:$4 sm:$0xff]   ;;  %v5268_v42 = vld [vmem:[#allocation5 + $0x14] ss:$48 sps:$4 sm:$0xff]  }
  0xde   : > { %3373 = vmatpush1.bf16.msra.mxu0 %v5173_v43  ;;  %3496 = vmatpush1.bf16.msra.mxu1 %v5176_v44  ;;  %v5271_v43 = vld [vmem:[#allocation5 + $0x1c] ss:$48 sps:$4 sm:$0xff]  }
  0xdf   : > { %3374 = vmatprep.subr.bf16.mxu0 %v5181_v45  ;;  %3497 = vmatprep.subr.bf16.mxu1 %v5184_v46  ;;  %v5265_v44 = vld [vmem:[%s6243_s9 + $0x10] ss:$0 sps:$4 sm:$0xff]   ;;  %v5266_v45 = vld [vmem:[#allocation5 + $0x10] ss:$48 sps:$4 sm:$0xff]  }
  0xe0   : > { %v5269_v46 = vld [vmem:[#allocation5 + $0x18] ss:$48 sps:$4 sm:$0xff]  }
  0xe2   : > { %3375 = vmatpush1.bf16.msra.mxu0 %v5179_v47  ;;  %3498 = vmatpush1.bf16.msra.mxu1 %v5182_v49  ;;  %v5274_v47 = vld [vmem:[#allocation5 + $0x74] ss:$48 sps:$4 sm:$0xff]   ;;  %v5277_v49 = vld [vmem:[#allocation5 + $0x7c] ss:$48 sps:$4 sm:$0xff]  }
  0xe3   : > { %3376 = vmatprep.subr.bf16.mxu0 %v5187_v50  ;;  %3499 = vmatprep.subr.bf16.mxu1 %v5190_v51  ;;  %v5272_v50 = vld [vmem:[#allocation5 + $0x70] ss:$48 sps:$4 sm:$0xff]   ;;  %v5275_v51 = vld [vmem:[#allocation5 + $0x78] ss:$48 sps:$4 sm:$0xff]  }
  0xe6   : > { %3377 = vmatpush1.bf16.msra.mxu0 %v5185_v52  ;;  %3500 = vmatpush1.bf16.msra.mxu1 %v5188_v53  ;;  %v5280_v52 = vld [vmem:[#allocation5 + $0xd4] ss:$48 sps:$4 sm:$0xff]   ;;  %v5283_v53 = vld [vmem:[#allocation5 + $0xdc] ss:$48 sps:$4 sm:$0xff]  }
  0xe7   : > { %3378 = vmatprep.subr.bf16.mxu0 %v5193_v54  ;;  %3501 = vmatprep.subr.bf16.mxu1 %v5196_v55  ;;  %v5278_v54 = vld [vmem:[#allocation5 + $0xd0] ss:$48 sps:$4 sm:$0xff]   ;;  %v5281_v55 = vld [vmem:[#allocation5 + $0xd8] ss:$48 sps:$4 sm:$0xff]  }
  0xea   : > { %3379 = vmatpush1.bf16.msra.mxu0 %v5191_v56  ;;  %3502 = vmatpush1.bf16.msra.mxu1 %v5194_v57  ;;  %v5286_v56 = vld [vmem:[#allocation5 + $0x134] ss:$48 sps:$4 sm:$0xff]   ;;  %v5289_v57 = vld [vmem:[#allocation5 + $0x13c] ss:$48 sps:$4 sm:$0xff]  }
  0xeb   : > { %3380 = vmatprep.subr.bf16.mxu0 %v5199_v58  ;;  %3503 = vmatprep.subr.bf16.mxu1 %v5202_v59  ;;  %v5284_v58 = vld [vmem:[#allocation5 + $0x130] ss:$48 sps:$4 sm:$0xff]   ;;  %v5287_v59 = vld [vmem:[#allocation5 + $0x138] ss:$48 sps:$4 sm:$0xff]  }
  0xee   : > { %3381 = vmatpush1.bf16.msra.mxu0 %v5197_v60  ;;  %3504 = vmatpush1.bf16.msra.mxu1 %v5200_v61  ;;  %v5292_v60 = vld [vmem:[#allocation5 + $0x194] ss:$48 sps:$4 sm:$0xff]   ;;  %v5295_v61 = vld [vmem:[#allocation5 + $0x19c] ss:$48 sps:$4 sm:$0xff]  }
  0xef   : > { %3382 = vmatprep.subr.bf16.mxu0 %v5205_v62  ;;  %3505 = vmatprep.subr.bf16.mxu1 %v5208_v63  ;;  %v5290_v62 = vld [vmem:[#allocation5 + $0x190] ss:$48 sps:$4 sm:$0xff]   ;;  %v5293_v63 = vld [vmem:[#allocation5 + $0x198] ss:$48 sps:$4 sm:$0xff]  }
  0xf2   : > { %3383 = vmatpush1.bf16.msra.mxu0 %v5203_v0  ;;  %3506 = vmatpush1.bf16.msra.mxu1 %v5206_v1  ;;  %v5298_v0 = vld [vmem:[#allocation5 + $0x1f4] ss:$48 sps:$4 sm:$0xff]   ;;  %v5301_v1 = vld [vmem:[#allocation5 + $0x1fc] ss:$48 sps:$4 sm:$0xff]  }
  0xf3   : > { %3384 = vmatprep.subr.bf16.mxu0 %v5211_v2  ;;  %3507 = vmatprep.subr.bf16.mxu1 %v5214_v3  ;;  %v5296_v2 = vld [vmem:[#allocation5 + $0x1f0] ss:$48 sps:$4 sm:$0xff]   ;;  %v5299_v3 = vld [vmem:[#allocation5 + $0x1f8] ss:$48 sps:$4 sm:$0xff]  }
  0xf6   : > { %3385 = vmatpush1.bf16.msra.mxu0 %v5209_v4  ;;  %3508 = vmatpush1.bf16.msra.mxu1 %v5212_v6  ;;  %v5304_v4 = vld [vmem:[#allocation5 + $0x254] ss:$48 sps:$4 sm:$0xff]   ;;  %v5307_v6 = vld [vmem:[#allocation5 + $0x25c] ss:$48 sps:$4 sm:$0xff]  }
  0xf7   : > { %3395 = vmatprep.subr.bf16.mxu0 %v5218_v7  ;;  %3518 = vmatprep.subr.bf16.mxu1 %v5221_v8  ;;  %v5302_v7 = vld [vmem:[#allocation5 + $0x250] ss:$48 sps:$4 sm:$0xff]   ;;  %v5305_v8 = vld [vmem:[#allocation5 + $0x258] ss:$48 sps:$4 sm:$0xff]  }
  0xf9   : > { %3387 = vmatmul.mubr.bf16.vlgmr.msra.gmra.mrb[0].mxu0 %v6273_v11  ;;  %3510 = vmatmul.mubr.bf16.vlgmr.msra.gmra.mrb[0].mxu1 %v6273_v11 }
  0xfa   : > { %3396 = vmatpush1.bf16.msra.mxu0 %v5216_v9  ;;  %3519 = vmatpush1.bf16.msra.mxu1 %v5219_v10  ;;  %v5310_v9 = vld [vmem:[#allocation5 + $0x2b4] ss:$48 sps:$4 sm:$0xff]   ;;  %v5313_v10 = vld [vmem:[#allocation5 + $0x2bc] ss:$48 sps:$4 sm:$0xff]  }
  0xfb   : > { %3397 = vmatprep.subr.bf16.mxu0 %v5225_v12  ;;  %3520 = vmatprep.subr.bf16.mxu1 %v5228_v13  ;;  %v5308_v12 = vld [vmem:[#allocation5 + $0x2b0] ss:$48 sps:$4 sm:$0xff]   ;;  %v5311_v13 = vld [vmem:[#allocation5 + $0x2b8] ss:$48 sps:$4 sm:$0xff]  }
  0xfc   : > { %3427 = vmatprep.mubr.bf16.mxu0 %v6018_v18  ;;  %3550 = vmatprep.mubr.bf16.mxu1 %v6018_v18 }
  0xfe   : > { %3398 = vmatpush1.bf16.msra.mxu0 %v5223_v14  ;;  %3521 = vmatpush1.bf16.msra.mxu1 %v5226_v15  ;;  %v5316_v14 = vld [vmem:[#allocation5 + $0x314] ss:$48 sps:$4 sm:$0xff]   ;;  %v5319_v15 = vld [vmem:[#allocation5 + $0x31c] ss:$48 sps:$4 sm:$0xff]  }
  0xff   : > { %3399 = vmatprep.subr.bf16.mxu0 %v5231_v16  ;;  %3522 = vmatprep.subr.bf16.mxu1 %v5234_v17  ;;  %v5314_v16 = vld [vmem:[#allocation5 + $0x310] ss:$48 sps:$4 sm:$0xff]   ;;  %v5317_v17 = vld [vmem:[#allocation5 + $0x318] ss:$48 sps:$4 sm:$0xff]  }
 0x102   : > { %3400 = vmatpush1.bf16.msra.mxu0 %v5229_v19  ;;  %3523 = vmatpush1.bf16.msra.mxu1 %v5232_v20  ;;  %v5322_v19 = vld [vmem:[#allocation5 + $0x374] ss:$48 sps:$4 sm:$0xff]   ;;  %v5325_v20 = vld [vmem:[#allocation5 + $0x37c] ss:$48 sps:$4 sm:$0xff]  }
 0x103   : > { %3401 = vmatprep.subr.bf16.mxu0 %v5237_v21  ;;  %3524 = vmatprep.subr.bf16.mxu1 %v5240_v22  ;;  %v5320_v21 = vld [vmem:[#allocation5 + $0x370] ss:$48 sps:$4 sm:$0xff]   ;;  %v5323_v22 = vld [vmem:[#allocation5 + $0x378] ss:$48 sps:$4 sm:$0xff]  }
 0x106   : > { %3402 = vmatpush1.bf16.msra.mxu0 %v5235_v23  ;;  %3525 = vmatpush1.bf16.msra.mxu1 %v5238_v24  ;;  %v5328_v23 = vld [vmem:[#allocation5 + $0x3d4] ss:$48 sps:$4 sm:$0xff]   ;;  %v5331_v24 = vld [vmem:[#allocation5 + $0x3dc] ss:$48 sps:$4 sm:$0xff]  }
 0x107   : > { %3403 = vmatprep.subr.bf16.mxu0 %v5243_v25  ;;  %3526 = vmatprep.subr.bf16.mxu1 %v5246_v26  ;;  %v5326_v25 = vld [vmem:[#allocation5 + $0x3d0] ss:$48 sps:$4 sm:$0xff]   ;;  %v5329_v26 = vld [vmem:[#allocation5 + $0x3d8] ss:$48 sps:$4 sm:$0xff]  }
 0x10a   : > { %3404 = vmatpush1.bf16.msra.mxu0 %v5241_v27  ;;  %3527 = vmatpush1.bf16.msra.mxu1 %v5244_v28  ;;  %v5334_v27 = vld [vmem:[#allocation5 + $0x434] ss:$48 sps:$4 sm:$0xff]   ;;  %v5337_v28 = vld [vmem:[#allocation5 + $0x43c] ss:$48 sps:$4 sm:$0xff]  }
 0x10b   : > { %3405 = vmatprep.subr.bf16.mxu0 %v5249_v29  ;;  %3528 = vmatprep.subr.bf16.mxu1 %v5252_v31  ;;  %v5332_v29 = vld [vmem:[#allocation5 + $0x430] ss:$48 sps:$4 sm:$0xff]   ;;  %v5335_v31 = vld [vmem:[#allocation5 + $0x438] ss:$48 sps:$4 sm:$0xff]  }
 0x10e   : > { %3406 = vmatpush1.bf16.msra.mxu0 %v5247_v32  ;;  %3529 = vmatpush1.bf16.msra.mxu1 %v5250_v33  ;;  %v5340_v32 = vld [vmem:[#allocation5 + $0x494] ss:$48 sps:$4 sm:$0xff]   ;;  %v5343_v33 = vld [vmem:[#allocation5 + $0x49c] ss:$48 sps:$4 sm:$0xff]  }
 0x10f   : > { %3407 = vmatprep.subr.bf16.mxu0 %v5255_v34  ;;  %3530 = vmatprep.subr.bf16.mxu1 %v5258_v35  ;;  %v5338_v34 = vld [vmem:[#allocation5 + $0x490] ss:$48 sps:$4 sm:$0xff]   ;;  %v5341_v35 = vld [vmem:[#allocation5 + $0x498] ss:$48 sps:$4 sm:$0xff]  }
 0x112   : > { %3408 = vmatpush1.bf16.msra.mxu0 %v5253_v36  ;;  %3531 = vmatpush1.bf16.msra.mxu1 %v5256_v37  ;;  %v5346_v36 = vld [vmem:[#allocation5 + $0x4f4] ss:$48 sps:$4 sm:$0xff]   ;;  %v5349_v37 = vld [vmem:[#allocation5 + $0x4fc] ss:$48 sps:$4 sm:$0xff]  }
 0x113   : > { %3409 = vmatprep.subr.bf16.mxu0 %v5261_v38  ;;  %3532 = vmatprep.subr.bf16.mxu1 %v5264_v39  ;;  %v5344_v38 = vld [vmem:[#allocation5 + $0x4f0] ss:$48 sps:$4 sm:$0xff]   ;;  %v5347_v39 = vld [vmem:[#allocation5 + $0x4f8] ss:$48 sps:$4 sm:$0xff]  }
 0x116   : > { %3410 = vmatpush1.bf16.msra.mxu0 %v5259_v40  ;;  %3533 = vmatpush1.bf16.msra.mxu1 %v5262_v41  ;;  %v5352_v40 = vld [vmem:[#allocation5 + $0x554] ss:$48 sps:$4 sm:$0xff]   ;;  %v5355_v41 = vld [vmem:[#allocation5 + $0x55c] ss:$48 sps:$4 sm:$0xff]  }
 0x117   : > { %3559 = vmatprep.subr.bf16.mxu0 %v5268_v42  ;;  %3682 = vmatprep.subr.bf16.mxu1 %v5271_v43  ;;  %v5350_v42 = vld [vmem:[#allocation5 + $0x550] ss:$48 sps:$4 sm:$0xff]   ;;  %v5353_v43 = vld [vmem:[#allocation5 + $0x558] ss:$48 sps:$4 sm:$0xff]  }
 0x119   : > { %3428 = vmatmul.mubr.bf16.vlgmr.msra.gmra.mrb[0].mxu0 %v5265_v44  ;;  %3551 = vmatmul.mubr.bf16.vlgmr.msra.gmra.mrb[0].mxu1 %v5265_v44  ;;  %v5358_v44 = vld [vmem:[#allocation5 + $0x5b4] ss:$48 sps:$4 sm:$0xff]  }
 0x11a   : > { %3560 = vmatpush1.bf16.msra.mxu0 %v5266_v45  ;;  %3683 = vmatpush1.bf16.msra.mxu1 %v5269_v46  ;;  %v5361_v45 = vld [vmem:[#allocation5 + $0x5bc] ss:$48 sps:$4 sm:$0xff]   ;;  %v5356_v46 = vld [vmem:[#allocation5 + $0x5b0] ss:$48 sps:$4 sm:$0xff]  }
 0x11b   : > { %3561 = vmatprep.subr.bf16.mxu0 %v5274_v47  ;;  %3684 = vmatprep.subr.bf16.mxu1 %v5277_v49  ;;  %v5359_v47 = vld [vmem:[#allocation5 + $0x5b8] ss:$48 sps:$4 sm:$0xff]   ;;  %v5364_v49 = vld [vmem:[#allocation5 + $0x614] ss:$48 sps:$4 sm:$0xff]  }
 0x11c   : > { %3591 = vmatprep.mubr.bf16.mxu0 %v6254_v48  ;;  %3714 = vmatprep.mubr.bf16.mxu1 %v6254_v48 }
 0x11e   : > { %3562 = vmatpush1.bf16.msra.mxu0 %v5272_v50  ;;  %3685 = vmatpush1.bf16.msra.mxu1 %v5275_v51  ;;  %v5367_v50 = vld [vmem:[#allocation5 + $0x61c] ss:$48 sps:$4 sm:$0xff]   ;;  %v5362_v51 = vld [vmem:[#allocation5 + $0x610] ss:$48 sps:$4 sm:$0xff]  }
 0x11f   : > { %3563 = vmatprep.subr.bf16.mxu0 %v5280_v52  ;;  %3686 = vmatprep.subr.bf16.mxu1 %v5283_v53  ;;  %v5365_v52 = vld [vmem:[#allocation5 + $0x618] ss:$48 sps:$4 sm:$0xff]   ;;  %v5370_v53 = vld [vmem:[#allocation5 + $0x674] ss:$48 sps:$4 sm:$0xff]  }
 0x122   : > { %3564 = vmatpush1.bf16.msra.mxu0 %v5278_v54  ;;  %3687 = vmatpush1.bf16.msra.mxu1 %v5281_v55  ;;  %v5373_v54 = vld [vmem:[#allocation5 + $0x67c] ss:$48 sps:$4 sm:$0xff]   ;;  %v5368_v55 = vld [vmem:[#allocation5 + $0x670] ss:$48 sps:$4 sm:$0xff]  }
 0x123   : > { %3565 = vmatprep.subr.bf16.mxu0 %v5286_v56  ;;  %3688 = vmatprep.subr.bf16.mxu1 %v5289_v57  ;;  %v5371_v56 = vld [vmem:[#allocation5 + $0x678] ss:$48 sps:$4 sm:$0xff]   ;;  %v5376_v57 = vld [vmem:[#allocation5 + $0x6d4] ss:$48 sps:$4 sm:$0xff]  }
 0x126   : > { %3566 = vmatpush1.bf16.msra.mxu0 %v5284_v58  ;;  %3689 = vmatpush1.bf16.msra.mxu1 %v5287_v59  ;;  %v5379_v58 = vld [vmem:[#allocation5 + $0x6dc] ss:$48 sps:$4 sm:$0xff]   ;;  %v5374_v59 = vld [vmem:[#allocation5 + $0x6d0] ss:$48 sps:$4 sm:$0xff]  }
 0x127   : > { %3567 = vmatprep.subr.bf16.mxu0 %v5292_v60  ;;  %3690 = vmatprep.subr.bf16.mxu1 %v5295_v61  ;;  %v5377_v60 = vld [vmem:[#allocation5 + $0x6d8] ss:$48 sps:$4 sm:$0xff]   ;;  %v5382_v61 = vld [vmem:[#allocation5 + $0x734] ss:$48 sps:$4 sm:$0xff]  }
 0x12a   : > { %3568 = vmatpush1.bf16.msra.mxu0 %v5290_v62  ;;  %3691 = vmatpush1.bf16.msra.mxu1 %v5293_v63  ;;  %v5385_v62 = vld [vmem:[#allocation5 + $0x73c] ss:$48 sps:$4 sm:$0xff]   ;;  %v5380_v63 = vld [vmem:[#allocation5 + $0x730] ss:$48 sps:$4 sm:$0xff]  }
 0x12b   : > { %3569 = vmatprep.subr.bf16.mxu0 %v5298_v0  ;;  %3692 = vmatprep.subr.bf16.mxu1 %v5301_v1  ;;  %v5383_v0 = vld [vmem:[#allocation5 + $0x738] ss:$48 sps:$4 sm:$0xff]   ;;  %v5388_v1 = vld [vmem:[#allocation5 + $0x794] ss:$48 sps:$4 sm:$0xff]  }
 0x12e   : > { %3570 = vmatpush1.bf16.msra.mxu0 %v5296_v2  ;;  %3693 = vmatpush1.bf16.msra.mxu1 %v5299_v3  ;;  %v5391_v2 = vld [vmem:[#allocation5 + $0x79c] ss:$48 sps:$4 sm:$0xff]   ;;  %v5386_v3 = vld [vmem:[#allocation5 + $0x790] ss:$48 sps:$4 sm:$0xff]  }
 0x12f   : > { %3571 = vmatprep.subr.bf16.mxu0 %v5304_v4  ;;  %3694 = vmatprep.subr.bf16.mxu1 %v5307_v6  ;;  %v5389_v4 = vld [vmem:[#allocation5 + $0x798] ss:$48 sps:$4 sm:$0xff]   ;;  %v5394_v6 = vld [vmem:[#allocation5 + $0x7f4] ss:$48 sps:$4 sm:$0xff]  }
 0x132   : > { %3572 = vmatpush1.bf16.msra.mxu0 %v5302_v7  ;;  %3695 = vmatpush1.bf16.msra.mxu1 %v5305_v8  ;;  %v5397_v7 = vld [vmem:[#allocation5 + $0x7fc] ss:$48 sps:$4 sm:$0xff]   ;;  %v5392_v8 = vld [vmem:[#allocation5 + $0x7f0] ss:$48 sps:$4 sm:$0xff]  }
 0x133   : > { %3573 = vmatprep.subr.bf16.mxu0 %v5310_v9  ;;  %3696 = vmatprep.subr.bf16.mxu1 %v5313_v10  ;;  %v5395_v9 = vld [vmem:[#allocation5 + $0x7f8] ss:$48 sps:$4 sm:$0xff]   ;;  %v5400_v10 = vld [vmem:[#allocation5 + $0x854] ss:$48 sps:$4 sm:$0xff]  }
 0x136   : > { %3574 = vmatpush1.bf16.msra.mxu0 %v5308_v12  ;;  %3697 = vmatpush1.bf16.msra.mxu1 %v5311_v13  ;;  %v5403_v12 = vld [vmem:[#allocation5 + $0x85c] ss:$48 sps:$4 sm:$0xff]   ;;  %v5398_v13 = vld [vmem:[#allocation5 + $0x850] ss:$48 sps:$4 sm:$0xff]  }
 0x137   : > { %3575 = vmatprep.subr.bf16.mxu0 %v5316_v14  ;;  %3698 = vmatprep.subr.bf16.mxu1 %v5319_v15  ;;  %v5401_v14 = vld [vmem:[#allocation5 + $0x858] ss:$48 sps:$4 sm:$0xff]   ;;  %v5406_v15 = vld [vmem:[#allocation5 + $0x8b4] ss:$48 sps:$4 sm:$0xff]  }
 0x13a   : > { %3576 = vmatpush1.bf16.msra.mxu0 %v5314_v16  ;;  %3699 = vmatpush1.bf16.msra.mxu1 %v5317_v17  ;;  %v5409_v16 = vld [vmem:[#allocation5 + $0x8bc] ss:$48 sps:$4 sm:$0xff]   ;;  %v5404_v17 = vld [vmem:[#allocation5 + $0x8b0] ss:$48 sps:$4 sm:$0xff]  }
 0x13b   : > { %3577 = vmatprep.subr.bf16.mxu0 %v5322_v19  ;;  %3700 = vmatprep.subr.bf16.mxu1 %v5325_v20  ;;  %v5407_v19 = vld [vmem:[#allocation5 + $0x8b8] ss:$48 sps:$4 sm:$0xff]   ;;  %v5412_v20 = vld [vmem:[#allocation5 + $0x914] ss:$48 sps:$4 sm:$0xff]  }
 0x13e   : > { %3578 = vmatpush1.bf16.msra.mxu0 %v5320_v21  ;;  %3701 = vmatpush1.bf16.msra.mxu1 %v5323_v22  ;;  %v5415_v21 = vld [vmem:[#allocation5 + $0x91c] ss:$48 sps:$4 sm:$0xff]   ;;  %v5410_v22 = vld [vmem:[#allocation5 + $0x910] ss:$48 sps:$4 sm:$0xff]  }
 0x13f   : > { %3579 = vmatprep.subr.bf16.mxu0 %v5328_v23  ;;  %3702 = vmatprep.subr.bf16.mxu1 %v5331_v24  ;;  %v5413_v23 = vld [vmem:[#allocation5 + $0x918] ss:$48 sps:$4 sm:$0xff]   ;;  %v5418_v24 = vld [vmem:[#allocation5 + $0x974] ss:$48 sps:$4 sm:$0xff]  }
 0x142   : > { %3580 = vmatpush1.bf16.msra.mxu0 %v5326_v25  ;;  %3703 = vmatpush1.bf16.msra.mxu1 %v5329_v26  ;;  %v5421_v25 = vld [vmem:[#allocation5 + $0x97c] ss:$48 sps:$4 sm:$0xff]   ;;  %v5416_v26 = vld [vmem:[#allocation5 + $0x970] ss:$48 sps:$4 sm:$0xff]  }
 0x143   : > { %3581 = vmatprep.subr.bf16.mxu0 %v5334_v27  ;;  %3704 = vmatprep.subr.bf16.mxu1 %v5337_v28  ;;  %v5419_v27 = vld [vmem:[#allocation5 + $0x978] ss:$48 sps:$4 sm:$0xff]   ;;  %v5424_v28 = vld [vmem:[#allocation5 + $0x9d4] ss:$48 sps:$4 sm:$0xff]  }
 0x146   : > { %3582 = vmatpush1.bf16.msra.mxu0 %v5332_v29  ;;  %3705 = vmatpush1.bf16.msra.mxu1 %v5335_v31  ;;  %v5427_v29 = vld [vmem:[#allocation5 + $0x9dc] ss:$48 sps:$4 sm:$0xff]   ;;  %v5422_v31 = vld [vmem:[#allocation5 + $0x9d0] ss:$48 sps:$4 sm:$0xff]  }
 0x147   : > { %3583 = vmatprep.subr.bf16.mxu0 %v5340_v32  ;;  %3706 = vmatprep.subr.bf16.mxu1 %v5343_v33  ;;  %v5425_v32 = vld [vmem:[#allocation5 + $0x9d8] ss:$48 sps:$4 sm:$0xff]   ;;  %v5430_v33 = vld [vmem:[#allocation5 + $0xa34] ss:$48 sps:$4 sm:$0xff]  }
 0x14a   : > { %3584 = vmatpush1.bf16.msra.mxu0 %v5338_v34  ;;  %3707 = vmatpush1.bf16.msra.mxu1 %v5341_v35  ;;  %v5433_v34 = vld [vmem:[#allocation5 + $0xa3c] ss:$48 sps:$4 sm:$0xff]   ;;  %v5428_v35 = vld [vmem:[#allocation5 + $0xa30] ss:$48 sps:$4 sm:$0xff]  }
 0x14b   : > { %3585 = vmatprep.subr.bf16.mxu0 %v5346_v36  ;;  %3708 = vmatprep.subr.bf16.mxu1 %v5349_v37  ;;  %v5431_v36 = vld [vmem:[#allocation5 + $0xa38] ss:$48 sps:$4 sm:$0xff]   ;;  %v5436_v37 = vld [vmem:[#allocation5 + $0xa94] ss:$48 sps:$4 sm:$0xff]  }
 0x14e   : > { %3586 = vmatpush1.bf16.msra.mxu0 %v5344_v38  ;;  %3709 = vmatpush1.bf16.msra.mxu1 %v5347_v39  ;;  %v5439_v38 = vld [vmem:[#allocation5 + $0xa9c] ss:$48 sps:$4 sm:$0xff]   ;;  %v5434_v39 = vld [vmem:[#allocation5 + $0xa90] ss:$48 sps:$4 sm:$0xff]  }
 0x14f   : > { %3587 = vmatprep.subr.bf16.mxu0 %v5352_v40  ;;  %3710 = vmatprep.subr.bf16.mxu1 %v5355_v41  ;;  %v5437_v40 = vld [vmem:[#allocation5 + $0xa98] ss:$48 sps:$4 sm:$0xff]   ;;  %v5442_v41 = vld [vmem:[#allocation5 + $0xaf4] ss:$48 sps:$4 sm:$0xff]  }
 0x152   : > { %3588 = vmatpush1.bf16.msra.mxu0 %v5350_v42  ;;  %3711 = vmatpush1.bf16.msra.mxu1 %v5353_v43  ;;  %v5445_v42 = vld [vmem:[#allocation5 + $0xafc] ss:$48 sps:$4 sm:$0xff]   ;;  %v5440_v43 = vld [vmem:[#allocation5 + $0xaf0] ss:$48 sps:$4 sm:$0xff]  }
 0x153   : > { %3589 = vmatprep.subr.bf16.mxu0 %v5358_v44  ;;  %3712 = vmatprep.subr.bf16.mxu1 %v5361_v45  ;;  %v5443_v44 = vld [vmem:[#allocation5 + $0xaf8] ss:$48 sps:$4 sm:$0xff]   ;;  %v5448_v45 = vld [vmem:[#allocation5 + $0xb54] ss:$48 sps:$4 sm:$0xff]  }
 0x156   : > { %3590 = vmatpush1.bf16.msra.mxu0 %v5356_v46  ;;  %3713 = vmatpush1.bf16.msra.mxu1 %v5359_v47  ;;  %v5451_v46 = vld [vmem:[#allocation5 + $0xb5c] ss:$48 sps:$4 sm:$0xff]   ;;  %v5446_v47 = vld [vmem:[#allocation5 + $0xb50] ss:$48 sps:$4 sm:$0xff]  }
 0x157   : > { %3600 = vmatprep.subr.bf16.mxu0 %v5364_v49  ;;  %3723 = vmatprep.subr.bf16.mxu1 %v5367_v50  ;;  %v5449_v49 = vld [vmem:[#allocation5 + $0xb58] ss:$48 sps:$4 sm:$0xff]   ;;  %v5454_v50 = vld [vmem:[#allocation5 + $0xbb4] ss:$48 sps:$4 sm:$0xff]  }
 0x159   : > { %3592 = vmatmul.mubr.bf16.vlgmr.msra.gmra.mrb[4].mxu0 %v6258_v5  ;;  %3715 = vmatmul.mubr.bf16.vlgmr.msra.gmra.mrb[4].mxu1 %v6258_v5 }
 0x15a   : > { %3601 = vmatpush1.bf16.msra.mxu0 %v5362_v51  ;;  %3724 = vmatpush1.bf16.msra.mxu1 %v5365_v52  ;;  %v5457_v51 = vld [vmem:[#allocation5 + $0xbbc] ss:$48 sps:$4 sm:$0xff]   ;;  %v5452_v52 = vld [vmem:[#allocation5 + $0xbb0] ss:$48 sps:$4 sm:$0xff]  }
 0x15b   : > { %3602 = vmatprep.subr.bf16.mxu0 %v5370_v53  ;;  %3725 = vmatprep.subr.bf16.mxu1 %v5373_v54  ;;  %v5455_v53 = vld [vmem:[#allocation5 + $0xbb8] ss:$48 sps:$4 sm:$0xff]   ;;  %v5460_v54 = vld [vmem:[#allocation5 + $0xc14] ss:$48 sps:$4 sm:$0xff]  }
 0x15c   : > { %3632 = vmatprep.mubr.bf16.mxu0 %v6267_v30  ;;  %3755 = vmatprep.mubr.bf16.mxu1 %v6267_v30 }
 0x15e   : > { %3603 = vmatpush1.bf16.msra.mxu0 %v5368_v55  ;;  %3726 = vmatpush1.bf16.msra.mxu1 %v5371_v56  ;;  %v5463_v55 = vld [vmem:[#allocation5 + $0xc1c] ss:$48 sps:$4 sm:$0xff]   ;;  %v5458_v56 = vld [vmem:[#allocation5 + $0xc10] ss:$48 sps:$4 sm:$0xff]  }
 0x15f   : > { %3604 = vmatprep.subr.bf16.mxu0 %v5376_v57  ;;  %3727 = vmatprep.subr.bf16.mxu1 %v5379_v58  ;;  %v5461_v57 = vld [vmem:[#allocation5 + $0xc18] ss:$48 sps:$4 sm:$0xff]   ;;  %v5466_v58 = vld [vmem:[#allocation5 + $0xc74] ss:$48 sps:$4 sm:$0xff]  }
 0x162   : > { %3605 = vmatpush1.bf16.msra.mxu0 %v5374_v59  ;;  %3728 = vmatpush1.bf16.msra.mxu1 %v5377_v60  ;;  %v5469_v59 = vld [vmem:[#allocation5 + $0xc7c] ss:$48 sps:$4 sm:$0xff]   ;;  %v5464_v60 = vld [vmem:[#allocation5 + $0xc70] ss:$48 sps:$4 sm:$0xff]  }
 0x163   : > { %3606 = vmatprep.subr.bf16.mxu0 %v5382_v61  ;;  %3729 = vmatprep.subr.bf16.mxu1 %v5385_v62  ;;  %v5467_v61 = vld [vmem:[#allocation5 + $0xc78] ss:$48 sps:$4 sm:$0xff]   ;;  %v5472_v62 = vld [vmem:[#allocation5 + $0xcd4] ss:$48 sps:$4 sm:$0xff]  }
 0x166   : > { %3607 = vmatpush1.bf16.msra.mxu0 %v5380_v63  ;;  %3730 = vmatpush1.bf16.msra.mxu1 %v5383_v0  ;;  %v5475_v63 = vld [vmem:[#allocation5 + $0xcdc] ss:$48 sps:$4 sm:$0xff]   ;;  %v5470_v0 = vld [vmem:[#allocation5 + $0xcd0] ss:$48 sps:$4 sm:$0xff]  }
 0x167   : > { %3608 = vmatprep.subr.bf16.mxu0 %v5388_v1  ;;  %3731 = vmatprep.subr.bf16.mxu1 %v5391_v2  ;;  %v5473_v1 = vld [vmem:[#allocation5 + $0xcd8] ss:$48 sps:$4 sm:$0xff]   ;;  %v5478_v2 = vld [vmem:[#allocation5 + $0xd34] ss:$48 sps:$4 sm:$0xff]  }
 0x16a   : > { %3609 = vmatpush1.bf16.msra.mxu0 %v5386_v3  ;;  %3732 = vmatpush1.bf16.msra.mxu1 %v5389_v4  ;;  %v5481_v3 = vld [vmem:[#allocation5 + $0xd3c] ss:$48 sps:$4 sm:$0xff]   ;;  %v5476_v4 = vld [vmem:[#allocation5 + $0xd30] ss:$48 sps:$4 sm:$0xff]  }
 0x16b   : > { %3610 = vmatprep.subr.bf16.mxu0 %v5394_v6  ;;  %3733 = vmatprep.subr.bf16.mxu1 %v5397_v7  ;;  %v5479_v6 = vld [vmem:[#allocation5 + $0xd38] ss:$48 sps:$4 sm:$0xff]   ;;  %v5484_v7 = vld [vmem:[#allocation5 + $0xd94] ss:$48 sps:$4 sm:$0xff]  }
 0x16e   : > { %3611 = vmatpush1.bf16.msra.mxu0 %v5392_v8  ;;  %3734 = vmatpush1.bf16.msra.mxu1 %v5395_v9  ;;  %v5487_v8 = vld [vmem:[#allocation5 + $0xd9c] ss:$48 sps:$4 sm:$0xff]   ;;  %v5482_v9 = vld [vmem:[#allocation5 + $0xd90] ss:$48 sps:$4 sm:$0xff]  }
 0x16f   : > { %3612 = vmatprep.subr.bf16.mxu0 %v5400_v10  ;;  %3735 = vmatprep.subr.bf16.mxu1 %v5403_v12  ;;  %v5485_v10 = vld [vmem:[#allocation5 + $0xd98] ss:$48 sps:$4 sm:$0xff]   ;;  %v5490_v12 = vld [vmem:[#allocation5 + $0xdf4] ss:$48 sps:$4 sm:$0xff]  }
 0x172   : > { %3613 = vmatpush1.bf16.msra.mxu0 %v5398_v13  ;;  %3736 = vmatpush1.bf16.msra.mxu1 %v5401_v14  ;;  %v5493_v13 = vld [vmem:[#allocation5 + $0xdfc] ss:$48 sps:$4 sm:$0xff]   ;;  %v5488_v14 = vld [vmem:[#allocation5 + $0xdf0] ss:$48 sps:$4 sm:$0xff]  }
 0x173   : > { %3614 = vmatprep.subr.bf16.mxu0 %v5406_v15  ;;  %3737 = vmatprep.subr.bf16.mxu1 %v5409_v16  ;;  %v5491_v15 = vld [vmem:[#allocation5 + $0xdf8] ss:$48 sps:$4 sm:$0xff]   ;;  %v5496_v16 = vld [vmem:[#allocation5 + $0xe54] ss:$48 sps:$4 sm:$0xff]  }
 0x176   : > { %3615 = vmatpush1.bf16.msra.mxu0 %v5404_v17  ;;  %3738 = vmatpush1.bf16.msra.mxu1 %v5407_v19  ;;  %v5499_v17 = vld [vmem:[#allocation5 + $0xe5c] ss:$48 sps:$4 sm:$0xff]   ;;  %v5494_v19 = vld [vmem:[#allocation5 + $0xe50] ss:$48 sps:$4 sm:$0xff]  }
 0x177   : > { %3616 = vmatprep.subr.bf16.mxu0 %v5412_v20  ;;  %3739 = vmatprep.subr.bf16.mxu1 %v5415_v21  ;;  %v5497_v20 = vld [vmem:[#allocation5 + $0xe58] ss:$48 sps:$4 sm:$0xff]   ;;  %v5502_v21 = vld [vmem:[#allocation5 + $0xeb4] ss:$48 sps:$4 sm:$0xff]  }
 0x17a   : > { %3617 = vmatpush1.bf16.msra.mxu0 %v5410_v22  ;;  %3740 = vmatpush1.bf16.msra.mxu1 %v5413_v23  ;;  %v5505_v22 = vld [vmem:[#allocation5 + $0xebc] ss:$48 sps:$4 sm:$0xff]   ;;  %v5500_v23 = vld [vmem:[#allocation5 + $0xeb0] ss:$48 sps:$4 sm:$0xff]  }
 0x17b   : > { %3618 = vmatprep.subr.bf16.mxu0 %v5418_v24  ;;  %3741 = vmatprep.subr.bf16.mxu1 %v5421_v25  ;;  %v5503_v24 = vld [vmem:[#allocation5 + $0xeb8] ss:$48 sps:$4 sm:$0xff]   ;;  %v5508_v25 = vld [vmem:[#allocation5 + $0x24] ss:$48 sps:$4 sm:$0xff]  }
 0x17e   : > { %3619 = vmatpush1.bf16.msra.mxu0 %v5416_v26  ;;  %3742 = vmatpush1.bf16.msra.mxu1 %v5419_v27  ;;  %v5511_v26 = vld [vmem:[#allocation5 + $0x2c] ss:$48 sps:$4 sm:$0xff]   ;;  %v5506_v27 = vld [vmem:[#allocation5 + $0x20] ss:$48 sps:$4 sm:$0xff]  }
 0x17f   : > { %3620 = vmatprep.subr.bf16.mxu0 %v5424_v28  ;;  %3743 = vmatprep.subr.bf16.mxu1 %v5427_v29  ;;  %v5509_v28 = vld [vmem:[#allocation5 + $0x28] ss:$48 sps:$4 sm:$0xff]   ;;  %v5514_v29 = vld [vmem:[#allocation5 + $0x84] ss:$48 sps:$4 sm:$0xff]  }
 0x182   : > { %3621 = vmatpush1.bf16.msra.mxu0 %v5422_v31  ;;  %3744 = vmatpush1.bf16.msra.mxu1 %v5425_v32  ;;  %v5517_v31 = vld [vmem:[#allocation5 + $0x8c] ss:$48 sps:$4 sm:$0xff]  }
 0x183   : > { %3622 = vmatprep.subr.bf16.mxu0 %v5430_v33  ;;  %3745 = vmatprep.subr.bf16.mxu1 %v5433_v34  ;;  %v6291_v32 = vld [vmem:[%s6243_s9 + $0x10] ss:$0 sps:$4 sm:$0xff]   ;;  %v5512_v33 = vld [vmem:[#allocation5 + $0x80] ss:$48 sps:$4 sm:$0xff]   ;;  %s5833_s9 = scalar_lea.vmem %s4112_s18, 512 }
 0x184   : > { %v5515_v34 = vld [vmem:[#allocation5 + $0x88] ss:$48 sps:$4 sm:$0xff]   ;;  %p5834_p11 = scmp.ne.s32.totalorder %s4112_s18, %s5833_s9  ;;  %p5841_p12 = scmp.lt.s32.totalorder %s5839_s27, %s5833_s9 }
 0x186   : > { %3623 = vmatpush1.bf16.msra.mxu0 %v5428_v35  ;;  %3746 = vmatpush1.bf16.msra.mxu1 %v5431_v36  ;;  %v5520_v35 = vld [vmem:[#allocation5 + $0xe4] ss:$48 sps:$4 sm:$0xff]   ;;  %v5523_v36 = vld [vmem:[#allocation5 + $0xec] ss:$48 sps:$4 sm:$0xff]   ;;  %p5835_p13 = pnand %p5834_p11, %p6535_p2  ;;  %p5842_p0 = por %p5841_p12, %p5840_p7 }
 0x187   : > { %3624 = vmatprep.subr.bf16.mxu0 %v5436_v37  ;;  %3747 = vmatprep.subr.bf16.mxu1 %v5439_v38  ;;  %v5518_v37 = vld [vmem:[#allocation5 + $0xe0] ss:$48 sps:$4 sm:$0xff]   ;;  %v5521_v38 = vld [vmem:[#allocation5 + $0xe8] ss:$48 sps:$4 sm:$0xff]  }
 0x188   : > { %p5836_p5 = pneg %p5835_p13 }
 0x18a   : > { %3625 = vmatpush1.bf16.msra.mxu0 %v5434_v39  ;;  %3748 = vmatpush1.bf16.msra.mxu1 %v5437_v40  ;;  %v5526_v39 = vld [vmem:[#allocation5 + $0x144] ss:$48 sps:$4 sm:$0xff]   ;;  %v5529_v40 = vld [vmem:[#allocation5 + $0x14c] ss:$48 sps:$4 sm:$0xff]   ;;  %p5843_p1 = pnand %p5842_p0, %p5836_p5 }
 0x18b   : > { %3626 = vmatprep.subr.bf16.mxu0 %v5442_v41  ;;  %3749 = vmatprep.subr.bf16.mxu1 %v5445_v42  ;;  %v5524_v41 = vld [vmem:[#allocation5 + $0x140] ss:$48 sps:$4 sm:$0xff]   ;;  %v5527_v42 = vld [vmem:[#allocation5 + $0x148] ss:$48 sps:$4 sm:$0xff]  }
 0x18e   : > { %3627 = vmatpush1.bf16.msra.mxu0 %v5440_v43  ;;  %3750 = vmatpush1.bf16.msra.mxu1 %v5443_v44  ;;  %v5532_v43 = vld [vmem:[#allocation5 + $0x1a4] ss:$48 sps:$4 sm:$0xff]   ;;  %v5535_v44 = vld [vmem:[#allocation5 + $0x1ac] ss:$48 sps:$4 sm:$0xff]  }
 0x18f   : > { %3628 = vmatprep.subr.bf16.mxu0 %v5448_v45  ;;  %3751 = vmatprep.subr.bf16.mxu1 %v5451_v46  ;;  %v5530_v45 = vld [vmem:[#allocation5 + $0x1a0] ss:$48 sps:$4 sm:$0xff]   ;;  %v5538_v46 = vld [vmem:[#allocation5 + $0x204] ss:$48 sps:$4 sm:$0xff]  }
 0x192   : > { %3629 = vmatpush1.bf16.msra.mxu0 %v5446_v47  ;;  %3752 = vmatpush1.bf16.msra.mxu1 %v5449_v49  ;;  %v5541_v47 = vld [vmem:[#allocation5 + $0x20c] ss:$48 sps:$4 sm:$0xff]   ;;  %v5536_v49 = vld [vmem:[#allocation5 + $0x200] ss:$48 sps:$4 sm:$0xff]  }
 0x193   : > { %3630 = vmatprep.subr.bf16.mxu0 %v5454_v50  ;;  %3753 = vmatprep.subr.bf16.mxu1 %v5457_v51  ;;  %v5539_v50 = vld [vmem:[#allocation5 + $0x208] ss:$48 sps:$4 sm:$0xff]   ;;  %v5544_v51 = vld [vmem:[#allocation5 + $0x264] ss:$48 sps:$4 sm:$0xff]  }
 0x196   : > { %3631 = vmatpush1.bf16.msra.mxu0 %v5452_v52  ;;  %3754 = vmatpush1.bf16.msra.mxu1 %v5455_v53  ;;  %v5547_v52 = vld [vmem:[#allocation5 + $0x26c] ss:$48 sps:$4 sm:$0xff]   ;;  %v5542_v53 = vld [vmem:[#allocation5 + $0x260] ss:$48 sps:$4 sm:$0xff]  }
 0x197   : > { %3641 = vmatprep.subr.bf16.mxu0 %v5460_v54  ;;  %3764 = vmatprep.subr.bf16.mxu1 %v5463_v55  ;;  %v5545_v54 = vld [vmem:[#allocation5 + $0x268] ss:$48 sps:$4 sm:$0xff]   ;;  %v5550_v55 = vld [vmem:[#allocation5 + $0x2c4] ss:$48 sps:$4 sm:$0xff]  }
 0x199   : > { %3633 = vmatmul.mubr.bf16.vlgmr.msra.gmra.mrb[4].mxu0 %v6273_v11  ;;  %3756 = vmatmul.mubr.bf16.vlgmr.msra.gmra.mrb[4].mxu1 %v6273_v11 }
 0x19a   : > { %3642 = vmatpush1.bf16.msra.mxu0 %v5458_v56  ;;  %3765 = vmatpush1.bf16.msra.mxu1 %v5461_v57  ;;  %v5553_v56 = vld [vmem:[#allocation5 + $0x2cc] ss:$48 sps:$4 sm:$0xff]   ;;  %v5548_v57 = vld [vmem:[#allocation5 + $0x2c0] ss:$48 sps:$4 sm:$0xff]  }
 0x19b   : > { %3643 = vmatprep.subr.bf16.mxu0 %v5466_v58  ;;  %3766 = vmatprep.subr.bf16.mxu1 %v5469_v59  ;;  %v5551_v58 = vld [vmem:[#allocation5 + $0x2c8] ss:$48 sps:$4 sm:$0xff]   ;;  %v5556_v59 = vld [vmem:[#allocation5 + $0x324] ss:$48 sps:$4 sm:$0xff]  }
 0x19c   : > { %3673 = vmatprep.mubr.bf16.mxu0 %v6018_v18  ;;  %3796 = vmatprep.mubr.bf16.mxu1 %v6018_v18 }
 0x19e   : > { %3644 = vmatpush1.bf16.msra.mxu0 %v5464_v60  ;;  %3767 = vmatpush1.bf16.msra.mxu1 %v5467_v61  ;;  %v5559_v60 = vld [vmem:[#allocation5 + $0x32c] ss:$48 sps:$4 sm:$0xff]   ;;  %v5554_v61 = vld [vmem:[#allocation5 + $0x320] ss:$48 sps:$4 sm:$0xff]  }
 0x19f   : > { %3645 = vmatprep.subr.bf16.mxu0 %v5472_v62  ;;  %3768 = vmatprep.subr.bf16.mxu1 %v5475_v63  ;;  %v5557_v62 = vld [vmem:[#allocation5 + $0x328] ss:$48 sps:$4 sm:$0xff]   ;;  %v5562_v63 = vld [vmem:[#allocation5 + $0x384] ss:$48 sps:$4 sm:$0xff]  }
 0x1a2   : > { %3646 = vmatpush1.bf16.msra.mxu0 %v5470_v0  ;;  %3769 = vmatpush1.bf16.msra.mxu1 %v5473_v1  ;;  %v5565_v0 = vld [vmem:[#allocation5 + $0x38c] ss:$48 sps:$4 sm:$0xff]   ;;  %v5560_v1 = vld [vmem:[#allocation5 + $0x380] ss:$48 sps:$4 sm:$0xff]  }
 0x1a3   : > { %3647 = vmatprep.subr.bf16.mxu0 %v5478_v2  ;;  %3770 = vmatprep.subr.bf16.mxu1 %v5481_v3  ;;  %v5563_v2 = vld [vmem:[#allocation5 + $0x388] ss:$48 sps:$4 sm:$0xff]   ;;  %v5568_v3 = vld [vmem:[#allocation5 + $0x3e4] ss:$48 sps:$4 sm:$0xff]  }
 0x1a6   : > { %3648 = vmatpush1.bf16.msra.mxu0 %v5476_v4  ;;  %3771 = vmatpush1.bf16.msra.mxu1 %v5479_v6  ;;  %v5571_v4 = vld [vmem:[#allocation5 + $0x3ec] ss:$48 sps:$4 sm:$0xff]   ;;  %v835_v6 = vlaneseq }
 0x1a7   : > { %3649 = vmatprep.subr.bf16.mxu0 %v5484_v7  ;;  %3772 = vmatprep.subr.bf16.mxu1 %v5487_v8  ;;  %v5566_v7 = vld [vmem:[#allocation5 + $0x3e0] ss:$48 sps:$4 sm:$0xff]   ;;  %v5569_v8 = vld [vmem:[#allocation5 + $0x3e8] ss:$48 sps:$4 sm:$0xff]  }
 0x1aa   : > { %3650 = vmatpush1.bf16.msra.mxu0 %v5482_v9  ;;  %3773 = vmatpush1.bf16.msra.mxu1 %v5485_v10  ;;  %v5574_v9 = vld [vmem:[#allocation5 + $0x444] ss:$48 sps:$4 sm:$0xff]   ;;  %v5577_v10 = vld [vmem:[#allocation5 + $0x44c] ss:$48 sps:$4 sm:$0xff]  }
 0x1ab   : > { %3651 = vmatprep.subr.bf16.mxu0 %v5490_v12  ;;  %3774 = vmatprep.subr.bf16.mxu1 %v5493_v13  ;;  %v6297_v12 = vshrl.u32 %v835_v6, 7  ;;  %v5572_v13 = vld [vmem:[#allocation5 + $0x440] ss:$48 sps:$4 sm:$0xff]   ;;  %v5623_v6 = vld [vmem:[#allocation5 + $0x748] ss:$48 sps:$4 sm:$0xff]  }
 0x1ae   : > { %3652 = vmatpush1.bf16.msra.mxu0 %v5488_v14  ;;  %3775 = vmatpush1.bf16.msra.mxu1 %v5491_v15  ;;  %v5575_v14 = vld [vmem:[#allocation5 + $0x448] ss:$48 sps:$4 sm:$0xff]   ;;  %v5580_v15 = vld [vmem:[#allocation5 + $0x4a4] ss:$48 sps:$4 sm:$0xff]  }
 0x1af   : > { %3653 = vmatprep.subr.bf16.mxu0 %v5496_v16  ;;  %3776 = vmatprep.subr.bf16.mxu1 %v5499_v17  ;;  %v5583_v16 = vld [vmem:[#allocation5 + $0x4ac] ss:$48 sps:$4 sm:$0xff]   ;;  %v837_v17 = vsub.s32 0, %v6297_v12 }
 0x1b2   : > { %3654 = vmatpush1.bf16.msra.mxu0 %v5494_v19  ;;  %3777 = vmatpush1.bf16.msra.mxu1 %v5497_v20  ;;  %v845_v19 = vsub.s32 2, %v6297_v12  ;;  %v841_v20 = vsub.s32 1, %v6297_v12 }
 0x1b3   : > { %3655 = vmatprep.subr.bf16.mxu0 %v5502_v21  ;;  %3778 = vmatprep.subr.bf16.mxu1 %v5505_v22  ;;  %v5578_v21 = vld [vmem:[#allocation5 + $0x4a0] ss:$48 sps:$4 sm:$0xff]   ;;  %v5581_v22 = vld [vmem:[#allocation5 + $0x4a8] ss:$48 sps:$4 sm:$0xff]  }
 0x1b6   : > { %3656 = vmatpush1.bf16.msra.mxu0 %v5500_v23  ;;  %3779 = vmatpush1.bf16.msra.mxu1 %v5503_v24  ;;  %v6302_v23 = vld [vmem:[#allocation7] sm:$0xff]  ;;  %v849_v24 = vsub.s32 3, %v6297_v12 }
 0x1b7   : > { %3805 = vmatprep.subr.bf16.mxu0 %v5508_v25  ;;  %3928 = vmatprep.subr.bf16.mxu1 %v5511_v26  ;;  %v5586_v25 = vld [vmem:[#allocation5 + $0x504] ss:$48 sps:$4 sm:$0xff]   ;;  %v5589_v26 = vld [vmem:[#allocation5 + $0x50c] ss:$48 sps:$4 sm:$0xff]  }
 0x1b9   : > { %3674 = vmatmul.mubr.bf16.vlgmr.msra.gmra.mrb[4].mxu0 %v6291_v32  ;;  %3797 = vmatmul.mubr.bf16.vlgmr.msra.gmra.mrb[4].mxu1 %v6291_v32 }
 0x1ba   : > { %3806 = vmatpush1.bf16.msra.mxu0 %v5506_v27  ;;  %3929 = vmatpush1.bf16.msra.mxu1 %v5509_v28  ;;  %v838_v27 = vrot.slane %v6302_v23, %v837_v17  ;;  %v846_v28 = vrot.slane %v6302_v23, %v845_v19 }
 0x1bb   : > { %3807 = vmatprep.subr.bf16.mxu0 %v5514_v29  ;;  %3930 = vmatprep.subr.bf16.mxu1 %v5517_v31  ;;  %v842_v29 = vrot.slane %v6302_v23, %v841_v20  ;;  %v850_v31 = vrot.slane %v6302_v23, %v849_v24 }
 0x1bc   : > { %3837 = vmatprep.mubr.bf16.mxu0 %v6254_v48  ;;  %3960 = vmatprep.mubr.bf16.mxu1 %v6254_v48  ;;  %v5533_v48 = vld [vmem:[#allocation5 + $0x1a8] ss:$48 sps:$4 sm:$0xff]  }
 0x1be   : > { %3808 = vmatpush1.bf16.msra.mxu0 %v5512_v33  ;;  %3931 = vmatpush1.bf16.msra.mxu1 %v5515_v34  ;;  %v5584_v33 = vld [vmem:[#allocation5 + $0x500] ss:$48 sps:$4 sm:$0xff]   ;;  %v5587_v34 = vld [vmem:[#allocation5 + $0x508] ss:$48 sps:$4 sm:$0xff]  }
 0x1bf   : > { %3809 = vmatprep.subr.bf16.mxu0 %v5520_v35  ;;  %3932 = vmatprep.subr.bf16.mxu1 %v5523_v36  ;;  %v5592_v35 = vld [vmem:[#allocation5 + $0x564] ss:$48 sps:$4 sm:$0xff]   ;;  %v5595_v36 = vld [vmem:[#allocation5 + $0x56c] ss:$48 sps:$4 sm:$0xff]  }
 0x1c2   : > { %3810 = vmatpush1.bf16.msra.mxu0 %v5518_v37  ;;  %3933 = vmatpush1.bf16.msra.mxu1 %v5521_v38 }
 0x1c3   : > { %3811 = vmatprep.subr.bf16.mxu0 %v5526_v39  ;;  %3934 = vmatprep.subr.bf16.mxu1 %v5529_v40 }
 0x1c6   : > { %3812 = vmatpush1.bf16.msra.mxu0 %v5524_v41  ;;  %3935 = vmatpush1.bf16.msra.mxu1 %v5527_v42 }
 0x1c7   : > { %3813 = vmatprep.subr.bf16.mxu0 %v5532_v43  ;;  %3936 = vmatprep.subr.bf16.mxu1 %v5535_v44 }
 0x1ca   : > { %3814 = vmatpush1.bf16.msra.mxu0 %v5530_v45  ;;  %3937 = vmatpush1.bf16.msra.mxu1 %v5533_v48 }
 0x1cb   : > { %3815 = vmatprep.subr.bf16.mxu0 %v5538_v46  ;;  %3938 = vmatprep.subr.bf16.mxu1 %v5541_v47  ;;  %v5590_v46 = vld [vmem:[#allocation5 + $0x560] ss:$48 sps:$4 sm:$0xff]   ;;  %v5593_v47 = vld [vmem:[#allocation5 + $0x568] ss:$48 sps:$4 sm:$0xff]  }
 0x1ce   : > { %3816 = vmatpush1.bf16.msra.mxu0 %v5536_v49  ;;  %3939 = vmatpush1.bf16.msra.mxu1 %v5539_v50 }
 0x1cf   : > { %3817 = vmatprep.subr.bf16.mxu0 %v5544_v51  ;;  %3940 = vmatprep.subr.bf16.mxu1 %v5547_v52  ;;  %v5598_v51 = vld [vmem:[#allocation5 + $0x5c4] ss:$48 sps:$4 sm:$0xff]   ;;  %v5601_v52 = vld [vmem:[#allocation5 + $0x5cc] ss:$48 sps:$4 sm:$0xff]  }
 0x1d2   : > { %3818 = vmatpush1.bf16.msra.mxu0 %v5542_v53  ;;  %3941 = vmatpush1.bf16.msra.mxu1 %v5545_v54  ;;  %v5596_v53 = vld [vmem:[#allocation5 + $0x5c0] ss:$48 sps:$4 sm:$0xff]   ;;  %v5599_v54 = vld [vmem:[#allocation5 + $0x5c8] ss:$48 sps:$4 sm:$0xff]  }
 0x1d3   : > { %3819 = vmatprep.subr.bf16.mxu0 %v5550_v55  ;;  %3942 = vmatprep.subr.bf16.mxu1 %v5553_v56  ;;  %v5604_v55 = vld [vmem:[#allocation5 + $0x624] ss:$48 sps:$4 sm:$0xff]   ;;  %v5607_v56 = vld [vmem:[#allocation5 + $0x62c] ss:$48 sps:$4 sm:$0xff]  }
 0x1d6   : > { %3820 = vmatpush1.bf16.msra.mxu0 %v5548_v57  ;;  %3943 = vmatpush1.bf16.msra.mxu1 %v5551_v58  ;;  %v5602_v57 = vld [vmem:[#allocation5 + $0x620] ss:$48 sps:$4 sm:$0xff]   ;;  %v5605_v58 = vld [vmem:[#allocation5 + $0x628] ss:$48 sps:$4 sm:$0xff]  }
 0x1d7   : > { %3821 = vmatprep.subr.bf16.mxu0 %v5556_v59  ;;  %3944 = vmatprep.subr.bf16.mxu1 %v5559_v60  ;;  %v5610_v59 = vld [vmem:[#allocation5 + $0x684] ss:$48 sps:$4 sm:$0xff]   ;;  %v5613_v60 = vld [vmem:[#allocation5 + $0x68c] ss:$48 sps:$4 sm:$0xff]  }
 0x1da   : > { %3822 = vmatpush1.bf16.msra.mxu0 %v5554_v61  ;;  %3945 = vmatpush1.bf16.msra.mxu1 %v5557_v62  ;;  %v5608_v61 = vld [vmem:[#allocation5 + $0x680] ss:$48 sps:$4 sm:$0xff]   ;;  %v5611_v62 = vld [vmem:[#allocation5 + $0x688] ss:$48 sps:$4 sm:$0xff]  }
 0x1db   : > { %3823 = vmatprep.subr.bf16.mxu0 %v5562_v63  ;;  %3946 = vmatprep.subr.bf16.mxu1 %v5565_v0  ;;  %v5616_v63 = vld [vmem:[#allocation5 + $0x6e4] ss:$48 sps:$4 sm:$0xff]   ;;  %v5619_v0 = vld [vmem:[#allocation5 + $0x6ec] ss:$48 sps:$4 sm:$0xff]  }
 0x1de   : > { %3824 = vmatpush1.bf16.msra.mxu0 %v5560_v1  ;;  %3947 = vmatpush1.bf16.msra.mxu1 %v5563_v2  ;;  %v5614_v1 = vld [vmem:[#allocation5 + $0x6e0] ss:$48 sps:$4 sm:$0xff]   ;;  %v5617_v2 = vld [vmem:[#allocation5 + $0x6e8] ss:$48 sps:$4 sm:$0xff]  }
 0x1df   : > { %3825 = vmatprep.subr.bf16.mxu0 %v5568_v3  ;;  %3948 = vmatprep.subr.bf16.mxu1 %v5571_v4  ;;  %v5622_v3 = vld [vmem:[#allocation5 + $0x744] ss:$48 sps:$4 sm:$0xff]   ;;  %v5620_v4 = vld [vmem:[#allocation5 + $0x740] ss:$48 sps:$4 sm:$0xff]  }
 0x1e2   : > { %3826 = vmatpush1.bf16.msra.mxu0 %v5566_v7  ;;  %3949 = vmatpush1.bf16.msra.mxu1 %v5569_v8  ;;  %v5628_v7 = vld [vmem:[#allocation5 + $0x7a4] ss:$48 sps:$4 sm:$0xff]   ;;  %v5631_v8 = vld [vmem:[#allocation5 + $0x7ac] ss:$48 sps:$4 sm:$0xff]  }
 0x1e3   : > { %3827 = vmatprep.subr.bf16.mxu0 %v5574_v9  ;;  %3950 = vmatprep.subr.bf16.mxu1 %v5577_v10  ;;  %v5626_v9 = vld [vmem:[#allocation5 + $0x7a0] ss:$48 sps:$4 sm:$0xff]   ;;  %v5634_v10 = vld [vmem:[#allocation5 + $0x804] ss:$48 sps:$4 sm:$0xff]  }
 0x1e6   : > { %3828 = vmatpush1.bf16.msra.mxu0 %v5572_v13  ;;  %3951 = vmatpush1.bf16.msra.mxu1 %v5575_v14  ;;  %v5637_v13 = vld [vmem:[#allocation5 + $0x80c] ss:$48 sps:$4 sm:$0xff]   ;;  %v5632_v14 = vld [vmem:[#allocation5 + $0x800] ss:$48 sps:$4 sm:$0xff]  }
 0x1e7   : > { %3829 = vmatprep.subr.bf16.mxu0 %v5580_v15  ;;  %3952 = vmatprep.subr.bf16.mxu1 %v5583_v16  ;;  %v5635_v15 = vld [vmem:[#allocation5 + $0x808] ss:$48 sps:$4 sm:$0xff]   ;;  %v5640_v16 = vld [vmem:[#allocation5 + $0x864] ss:$48 sps:$4 sm:$0xff]  }
 0x1ea   : > { %3830 = vmatpush1.bf16.msra.mxu0 %v5578_v21  ;;  %3953 = vmatpush1.bf16.msra.mxu1 %v5581_v22  ;;  %v5643_v21 = vld [vmem:[#allocation5 + $0x86c] ss:$48 sps:$4 sm:$0xff]   ;;  %v5638_v22 = vld [vmem:[#allocation5 + $0x860] ss:$48 sps:$4 sm:$0xff]  }
 0x1eb   : > { %3831 = vmatprep.subr.bf16.mxu0 %v5586_v25  ;;  %3954 = vmatprep.subr.bf16.mxu1 %v5589_v26  ;;  %v5641_v25 = vld [vmem:[#allocation5 + $0x868] ss:$48 sps:$4 sm:$0xff]   ;;  %v5646_v26 = vld [vmem:[#allocation5 + $0x8c4] ss:$48 sps:$4 sm:$0xff]  }
 0x1ec   : > { %v3429_v37 = vpop.f32.mrb[0].mxu0  ;;  %v3552_v38 = vpop.f32.mrb[0].mxu1 }
 0x1ed   : > { %v4855_v39 = vadd.f32 %v3429_v37, %v838_v27  ;;  %v4857_v40 = vadd.f32 %v3552_v38, %v846_v28  ;;  %v3431_v41 = vpop.f32.mrb[1].mxu0  ;;  %v3554_v42 = vpop.f32.mrb[1].mxu1  ;;  %v5649_v27 = vld [vmem:[#allocation5 + $0x8cc] ss:$48 sps:$4 sm:$0xff]   ;;  %v5644_v28 = vld [vmem:[#allocation5 + $0x8c0] ss:$48 sps:$4 sm:$0xff]  }
 0x1ee   : > { %v4856_v43 = vadd.f32 %v3431_v41, %v842_v29  ;;  %v4858_v44 = vadd.f32 %v3554_v42, %v850_v31  ;;  %v3433_v45 = vpop.f32.mrb[2].mxu0  ;;  %v3556_v48 = vpop.f32.mrb[2].mxu1  ;;  %3832 = vmatpush1.bf16.msra.mxu0 %v5584_v33  ;;  %3955 = vmatpush1.bf16.msra.mxu1 %v5587_v34  ;;  %v5647_v29 = vld [vmem:[#allocation5 + $0x8c8] ss:$48 sps:$4 sm:$0xff]   ;;  %v5652_v31 = vld [vmem:[#allocation5 + $0x924] ss:$48 sps:$4 sm:$0xff]  }
 0x1ef   : > { %4051 = vst [vmem:[%s6319_s16] sm:$0xff] %v4855_v39  ;;  %4053 = vst [vmem:[%s6319_s16 + $0x10] sm:$0xff] %v4857_v40  ;;  %v3434_v49 = vpop.f32.mrb[3].mxu0  ;;  %v3557_v50 = vpop.f32.mrb[3].mxu1  ;;  %3833 = vmatprep.subr.bf16.mxu0 %v5592_v35  ;;  %3956 = vmatprep.subr.bf16.mxu1 %v5595_v36  ;;  %v5655_v33 = vld [vmem:[#allocation5 + $0x92c] ss:$48 sps:$4 sm:$0xff]  }
 0x1f0   : > { %4052 = vst [vmem:[%s6319_s16 + $0x8] sm:$0xff] %v4856_v43  ;;  %4054 = vst [vmem:[%s6326_s20] sm:$0xff] %v4858_v44  ;;  %v5650_v34 = vld [vmem:[#allocation5 + $0x920] ss:$48 sps:$4 sm:$0xff]   ;;  %v5653_v35 = vld [vmem:[#allocation5 + $0x928] ss:$48 sps:$4 sm:$0xff]  }
 0x1f1   : > { %v5658_v36 = vld [vmem:[#allocation5 + $0x984] ss:$48 sps:$4 sm:$0xff]   ;;  %v5661_v37 = vld [vmem:[#allocation5 + $0x98c] ss:$48 sps:$4 sm:$0xff]   ;;  %v5656_v38 = vld [vmem:[#allocation5 + $0x980] ss:$48 sps:$4 sm:$0xff]  }
 0x1f2   : > { %3834 = vmatpush1.bf16.msra.mxu0 %v5590_v46  ;;  %3957 = vmatpush1.bf16.msra.mxu1 %v5593_v47  ;;  %v5659_v39 = vld [vmem:[#allocation5 + $0x988] ss:$48 sps:$4 sm:$0xff]   ;;  %v5664_v40 = vld [vmem:[#allocation5 + $0x9e4] ss:$48 sps:$4 sm:$0xff]   ;;  %v5667_v41 = vld [vmem:[#allocation5 + $0x9ec] ss:$48 sps:$4 sm:$0xff]  }
 0x1f3   : > { %3835 = vmatprep.subr.bf16.mxu0 %v5598_v51  ;;  %3958 = vmatprep.subr.bf16.mxu1 %v5601_v52  ;;  %v5662_v42 = vld [vmem:[#allocation5 + $0x9e0] ss:$48 sps:$4 sm:$0xff]   ;;  %v5665_v43 = vld [vmem:[#allocation5 + $0x9e8] ss:$48 sps:$4 sm:$0xff]   ;;  %v5670_v44 = vld [vmem:[#allocation5 + $0xa44] ss:$48 sps:$4 sm:$0xff]  }
 0x1f4   : > { %v5673_v45 = vld [vmem:[#allocation5 + $0xa4c] ss:$48 sps:$4 sm:$0xff]   ;;  %v5668_v48 = vld [vmem:[#allocation5 + $0xa40] ss:$48 sps:$4 sm:$0xff]   ;;  %v5671_v46 = vld [vmem:[#allocation5 + $0xa48] ss:$48 sps:$4 sm:$0xff]  }
 0x1f5   : > { %v5676_v47 = vld [vmem:[#allocation5 + $0xaa4] ss:$48 sps:$4 sm:$0xff]   ;;  %v5679_v49 = vld [vmem:[#allocation5 + $0xaac] ss:$48 sps:$4 sm:$0xff]   ;;  %v5674_v50 = vld [vmem:[#allocation5 + $0xaa0] ss:$48 sps:$4 sm:$0xff]  }
 0x1f6   : > { %3836 = vmatpush1.bf16.msra.mxu0 %v5596_v53  ;;  %3959 = vmatpush1.bf16.msra.mxu1 %v5599_v54  ;;  %v5677_v51 = vld [vmem:[#allocation5 + $0xaa8] ss:$48 sps:$4 sm:$0xff]   ;;  %v5682_v52 = vld [vmem:[#allocation5 + $0xb04] ss:$48 sps:$4 sm:$0xff]   ;;  %v5685_v53 = vld [vmem:[#allocation5 + $0xb0c] ss:$48 sps:$4 sm:$0xff]  }
 0x1f7   : > { %3846 = vmatprep.subr.bf16.mxu0 %v5604_v55  ;;  %3969 = vmatprep.subr.bf16.mxu1 %v5607_v56  ;;  %v5680_v54 = vld [vmem:[#allocation5 + $0xb00] ss:$48 sps:$4 sm:$0xff]   ;;  %v5683_v55 = vld [vmem:[#allocation5 + $0xb08] ss:$48 sps:$4 sm:$0xff]   ;;  %v5688_v56 = vld [vmem:[#allocation5 + $0xb64] ss:$48 sps:$4 sm:$0xff]  }
 0x1f9   : > { %3838 = vmatmul.mubr.bf16.vlgmr.msra.gmra.mrb[8].mxu0 %v6258_v5  ;;  %3961 = vmatmul.mubr.bf16.vlgmr.msra.gmra.mrb[8].mxu1 %v6258_v5  ;;  %v5625_v5 = vld [vmem:[#allocation5 + $0x74c] ss:$48 sps:$4 sm:$0xff]  }
 0x1fa   : > { %3847 = vmatpush1.bf16.msra.mxu0 %v5602_v57  ;;  %3970 = vmatpush1.bf16.msra.mxu1 %v5605_v58  ;;  %v5691_v57 = vld [vmem:[#allocation5 + $0xb6c] ss:$48 sps:$4 sm:$0xff]   ;;  %v5686_v58 = vld [vmem:[#allocation5 + $0xb60] ss:$48 sps:$4 sm:$0xff]  }
 0x1fb   : > { %3848 = vmatprep.subr.bf16.mxu0 %v5610_v59  ;;  %3971 = vmatprep.subr.bf16.mxu1 %v5613_v60  ;;  %v5689_v59 = vld [vmem:[#allocation5 + $0xb68] ss:$48 sps:$4 sm:$0xff]   ;;  %v5694_v60 = vld [vmem:[#allocation5 + $0xbc4] ss:$48 sps:$4 sm:$0xff]  }
 0x1fc   : > { %3878 = vmatprep.mubr.bf16.mxu0 %v6267_v30  ;;  %4001 = vmatprep.mubr.bf16.mxu1 %v6267_v30  ;;  %v5629_v30 = vld [vmem:[#allocation5 + $0x7a8] ss:$48 sps:$4 sm:$0xff]  }
 0x1fe   : > { %3849 = vmatpush1.bf16.msra.mxu0 %v5608_v61  ;;  %3972 = vmatpush1.bf16.msra.mxu1 %v5611_v62  ;;  %v5697_v61 = vld [vmem:[#allocation5 + $0xbcc] ss:$48 sps:$4 sm:$0xff]   ;;  %v5692_v62 = vld [vmem:[#allocation5 + $0xbc0] ss:$48 sps:$4 sm:$0xff]  }
 0x1ff   : > { %3850 = vmatprep.subr.bf16.mxu0 %v5616_v63  ;;  %3973 = vmatprep.subr.bf16.mxu1 %v5619_v0  ;;  %v5695_v63 = vld [vmem:[#allocation5 + $0xbc8] ss:$48 sps:$4 sm:$0xff]   ;;  %v5700_v0 = vld [vmem:[#allocation5 + $0xc24] ss:$48 sps:$4 sm:$0xff]  }
 0x202   : > { %3851 = vmatpush1.bf16.msra.mxu0 %v5614_v1  ;;  %3974 = vmatpush1.bf16.msra.mxu1 %v5617_v2  ;;  %v5703_v1 = vld [vmem:[#allocation5 + $0xc2c] ss:$48 sps:$4 sm:$0xff]   ;;  %v5698_v2 = vld [vmem:[#allocation5 + $0xc20] ss:$48 sps:$4 sm:$0xff]  }
 0x203   : > { %3852 = vmatprep.subr.bf16.mxu0 %v5622_v3  ;;  %3975 = vmatprep.subr.bf16.mxu1 %v5625_v5  ;;  %v5701_v3 = vld [vmem:[#allocation5 + $0xc28] ss:$48 sps:$4 sm:$0xff]   ;;  %v5706_v5 = vld [vmem:[#allocation5 + $0xc84] ss:$48 sps:$4 sm:$0xff]  }
 0x206   : > { %3853 = vmatpush1.bf16.msra.mxu0 %v5620_v4  ;;  %3976 = vmatpush1.bf16.msra.mxu1 %v5623_v6  ;;  %v5709_v4 = vld [vmem:[#allocation5 + $0xc8c] ss:$48 sps:$4 sm:$0xff]   ;;  %v5704_v6 = vld [vmem:[#allocation5 + $0xc80] ss:$48 sps:$4 sm:$0xff]  }
 0x207   : > { %3854 = vmatprep.subr.bf16.mxu0 %v5628_v7  ;;  %3977 = vmatprep.subr.bf16.mxu1 %v5631_v8  ;;  %v5707_v7 = vld [vmem:[#allocation5 + $0xc88] ss:$48 sps:$4 sm:$0xff]   ;;  %v5712_v8 = vld [vmem:[#allocation5 + $0xce4] ss:$48 sps:$4 sm:$0xff]  }
 0x20a   : > { %3855 = vmatpush1.bf16.msra.mxu0 %v5626_v9  ;;  %3978 = vmatpush1.bf16.msra.mxu1 %v5629_v30  ;;  %v5715_v9 = vld [vmem:[#allocation5 + $0xcec] ss:$48 sps:$4 sm:$0xff]   ;;  %v5710_v30 = vld [vmem:[#allocation5 + $0xce0] ss:$48 sps:$4 sm:$0xff]  }
 0x20b   : > { %3856 = vmatprep.subr.bf16.mxu0 %v5634_v10  ;;  %3979 = vmatprep.subr.bf16.mxu1 %v5637_v13  ;;  %v5713_v10 = vld [vmem:[#allocation5 + $0xce8] ss:$48 sps:$4 sm:$0xff]   ;;  %v5718_v13 = vld [vmem:[#allocation5 + $0xd44] ss:$48 sps:$4 sm:$0xff]  }
 0x20e   : > { %3857 = vmatpush1.bf16.msra.mxu0 %v5632_v14  ;;  %3980 = vmatpush1.bf16.msra.mxu1 %v5635_v15  ;;  %v5716_v14 = vld [vmem:[#allocation5 + $0xd40] ss:$48 sps:$4 sm:$0xff]   ;;  %v5719_v15 = vld [vmem:[#allocation5 + $0xd48] ss:$48 sps:$4 sm:$0xff]  }
 0x20f   : > { %3858 = vmatprep.subr.bf16.mxu0 %v5640_v16  ;;  %3981 = vmatprep.subr.bf16.mxu1 %v5643_v21  ;;  %v5724_v16 = vld [vmem:[#allocation5 + $0xda4] ss:$48 sps:$4 sm:$0xff]   ;;  %v5727_v21 = vld [vmem:[#allocation5 + $0xdac] ss:$48 sps:$4 sm:$0xff]  }
 0x212   : > { %3859 = vmatpush1.bf16.msra.mxu0 %v5638_v22  ;;  %3982 = vmatpush1.bf16.msra.mxu1 %v5641_v25  ;;  %v5722_v22 = vld [vmem:[#allocation5 + $0xda0] ss:$48 sps:$4 sm:$0xff]   ;;  %v5730_v25 = vld [vmem:[#allocation5 + $0xe04] ss:$48 sps:$4 sm:$0xff]  }
 0x213   : > { %3860 = vmatprep.subr.bf16.mxu0 %v5646_v26  ;;  %3983 = vmatprep.subr.bf16.mxu1 %v5649_v27  ;;  %v5733_v26 = vld [vmem:[#allocation5 + $0xe0c] ss:$48 sps:$4 sm:$0xff]   ;;  %v5728_v27 = vld [vmem:[#allocation5 + $0xe00] ss:$48 sps:$4 sm:$0xff]  }
 0x216   : > { %3861 = vmatpush1.bf16.msra.mxu0 %v5644_v28  ;;  %3984 = vmatpush1.bf16.msra.mxu1 %v5647_v29  ;;  %v5731_v28 = vld [vmem:[#allocation5 + $0xe08] ss:$48 sps:$4 sm:$0xff]   ;;  %v5736_v29 = vld [vmem:[#allocation5 + $0xe64] ss:$48 sps:$4 sm:$0xff]  }
 0x217   : > { %3862 = vmatprep.subr.bf16.mxu0 %v5652_v31  ;;  %3985 = vmatprep.subr.bf16.mxu1 %v5655_v33  ;;  %v5739_v31 = vld [vmem:[#allocation5 + $0xe6c] ss:$48 sps:$4 sm:$0xff]   ;;  %v5734_v33 = vld [vmem:[#allocation5 + $0xe60] ss:$48 sps:$4 sm:$0xff]  }
 0x21a   : > { %3863 = vmatpush1.bf16.msra.mxu0 %v5650_v34  ;;  %3986 = vmatpush1.bf16.msra.mxu1 %v5653_v35  ;;  %v5737_v34 = vld [vmem:[#allocation5 + $0xe68] ss:$48 sps:$4 sm:$0xff]   ;;  %v5742_v35 = vld [vmem:[#allocation5 + $0xec4] ss:$48 sps:$4 sm:$0xff]  }
 0x21b   : > { %3864 = vmatprep.subr.bf16.mxu0 %v5658_v36  ;;  %3987 = vmatprep.subr.bf16.mxu1 %v5661_v37  ;;  %v5745_v36 = vld [vmem:[#allocation5 + $0xecc] ss:$48 sps:$4 sm:$0xff]   ;;  %v5740_v37 = vld [vmem:[#allocation5 + $0xec0] ss:$48 sps:$4 sm:$0xff]  }
 0x21e   : > { %3865 = vmatpush1.bf16.msra.mxu0 %v5656_v38  ;;  %3988 = vmatpush1.bf16.msra.mxu1 %v5659_v39  ;;  %v5743_v38 = vld [vmem:[#allocation5 + $0xec8] ss:$48 sps:$4 sm:$0xff]   ;;  %v853_v39 = vsub.s32 4, %v6297_v12 }
 0x21f   : > { %3866 = vmatprep.subr.bf16.mxu0 %v5664_v40  ;;  %3989 = vmatprep.subr.bf16.mxu1 %v5667_v41  ;;  %v861_v40 = vsub.s32 6, %v6297_v12  ;;  %v857_v41 = vsub.s32 5, %v6297_v12 }
 0x222   : > { %3867 = vmatpush1.bf16.msra.mxu0 %v5662_v42  ;;  %3990 = vmatpush1.bf16.msra.mxu1 %v5665_v43  ;;  %v865_v42 = vsub.s32 7, %v6297_v12  ;;  %v854_v43 = vrot.slane %v6302_v23, %v853_v39 }
 0x223   : > { %3868 = vmatprep.subr.bf16.mxu0 %v5670_v44  ;;  %3991 = vmatprep.subr.bf16.mxu1 %v5673_v45  ;;  %v862_v44 = vrot.slane %v6302_v23, %v861_v40  ;;  %v858_v45 = vrot.slane %v6302_v23, %v857_v41 }
 0x226   : > { %3869 = vmatpush1.bf16.msra.mxu0 %v5668_v48  ;;  %3992 = vmatpush1.bf16.msra.mxu1 %v5671_v46  ;;  %v866_v48 = vrot.slane %v6302_v23, %v865_v42 }
 0x227   : > { %3870 = vmatprep.subr.bf16.mxu0 %v5676_v47  ;;  %3993 = vmatprep.subr.bf16.mxu1 %v5679_v49 }
 0x22a   : > { %3871 = vmatpush1.bf16.msra.mxu0 %v5674_v50  ;;  %3994 = vmatpush1.bf16.msra.mxu1 %v5677_v51 }
 0x22b   : > { %3872 = vmatprep.subr.bf16.mxu0 %v5682_v52  ;;  %3995 = vmatprep.subr.bf16.mxu1 %v5685_v53 }
 0x22e   : > { %3873 = vmatpush1.bf16.msra.mxu0 %v5680_v54  ;;  %3996 = vmatpush1.bf16.msra.mxu1 %v5683_v55 }
 0x22f   : > { %3874 = vmatprep.subr.bf16.mxu0 %v5688_v56  ;;  %3997 = vmatprep.subr.bf16.mxu1 %v5691_v57 }
 0x232   : > { %3875 = vmatpush1.bf16.msra.mxu0 %v5686_v58  ;;  %3998 = vmatpush1.bf16.msra.mxu1 %v5689_v59 }
 0x233   : > { %3876 = vmatprep.subr.bf16.mxu0 %v5694_v60  ;;  %3999 = vmatprep.subr.bf16.mxu1 %v5697_v61 }
 0x236   : > { %3877 = vmatpush1.bf16.msra.mxu0 %v5692_v62  ;;  %4000 = vmatpush1.bf16.msra.mxu1 %v5695_v63 }
 0x237   : > { %3887 = vmatprep.subr.bf16.mxu0 %v5700_v0  ;;  %4010 = vmatprep.subr.bf16.mxu1 %v5703_v1 }
 0x239   : > { %3879 = vmatmul.mubr.bf16.vlgmr.msra.gmra.mrb[8].mxu0 %v6273_v11  ;;  %4002 = vmatmul.mubr.bf16.vlgmr.msra.gmra.mrb[8].mxu1 %v6273_v11  ;;  %v5721_v11 = vld [vmem:[#allocation5 + $0xd4c] ss:$48 sps:$4 sm:$0xff]  }
 0x23a   : > { %3888 = vmatpush1.bf16.msra.mxu0 %v5698_v2  ;;  %4011 = vmatpush1.bf16.msra.mxu1 %v5701_v3 }
 0x23b   : > { %3889 = vmatprep.subr.bf16.mxu0 %v5706_v5  ;;  %4012 = vmatprep.subr.bf16.mxu1 %v5709_v4 }
 0x23c   : > { %3919 = vmatprep.mubr.bf16.mxu0 %v6018_v18  ;;  %4042 = vmatprep.mubr.bf16.mxu1 %v6018_v18  ;;  %v5725_v18 = vld [vmem:[#allocation5 + $0xda8] ss:$48 sps:$4 sm:$0xff]  }
 0x23e   : > { %3890 = vmatpush1.bf16.msra.mxu0 %v5704_v6  ;;  %4013 = vmatpush1.bf16.msra.mxu1 %v5707_v7 }
 0x23f   : > { %3891 = vmatprep.subr.bf16.mxu0 %v5712_v8  ;;  %4014 = vmatprep.subr.bf16.mxu1 %v5715_v9 }
 0x242   : > { %3892 = vmatpush1.bf16.msra.mxu0 %v5710_v30  ;;  %4015 = vmatpush1.bf16.msra.mxu1 %v5713_v10 }
 0x243   : > { %3893 = vmatprep.subr.bf16.mxu0 %v5718_v13  ;;  %4016 = vmatprep.subr.bf16.mxu1 %v5721_v11 }
 0x246   : > { %3894 = vmatpush1.bf16.msra.mxu0 %v5716_v14  ;;  %4017 = vmatpush1.bf16.msra.mxu1 %v5719_v15 }
 0x247   : > { %3895 = vmatprep.subr.bf16.mxu0 %v5724_v16  ;;  %4018 = vmatprep.subr.bf16.mxu1 %v5727_v21 }
 0x24a   : > { %3896 = vmatpush1.bf16.msra.mxu0 %v5722_v22  ;;  %4019 = vmatpush1.bf16.msra.mxu1 %v5725_v18 }
 0x24b   : > { %3897 = vmatprep.subr.bf16.mxu0 %v5730_v25  ;;  %4020 = vmatprep.subr.bf16.mxu1 %v5733_v26 }
 0x24e   : > { %3898 = vmatpush1.bf16.msra.mxu0 %v5728_v27  ;;  %4021 = vmatpush1.bf16.msra.mxu1 %v5731_v28 }
 0x24f   : > { %3899 = vmatprep.subr.bf16.mxu0 %v5736_v29  ;;  %4022 = vmatprep.subr.bf16.mxu1 %v5739_v31 }
 0x252   : > { %3900 = vmatpush1.bf16.msra.mxu0 %v5734_v33  ;;  %4023 = vmatpush1.bf16.msra.mxu1 %v5737_v34 }
 0x253   : > { %3901 = vmatprep.subr.bf16.mxu0 %v5742_v35  ;;  %4024 = vmatprep.subr.bf16.mxu1 %v5745_v36 }
 0x256   : > { %3902 = vmatpush1.bf16.msra.mxu0 %v5740_v37  ;;  %4025 = vmatpush1.bf16.msra.mxu1 %v5743_v38 }
 0x259   : > { %3920 = vmatmul.mubr.bf16.vlgmr.msra.gmra.mrb[8].mxu0 %v6291_v32  ;;  %4043 = vmatmul.mubr.bf16.vlgmr.msra.gmra.mrb[8].mxu1 %v6291_v32 }
 0x28c   : > { %v3675_v32 = vpop.f32.mrb[4].mxu0  ;;  %v3798_v46 = vpop.f32.mrb[4].mxu1 }
 0x28d   : > { %v4859_v47 = vadd.f32 %v3675_v32, %v854_v43  ;;  %v4861_v49 = vadd.f32 %v3798_v46, %v862_v44  ;;  %v3677_v50 = vpop.f32.mrb[5].mxu0  ;;  %v3800_v51 = vpop.f32.mrb[5].mxu1 }
 0x28e   : > { %v4860_v52 = vadd.f32 %v3677_v50, %v858_v45  ;;  %v4862_v53 = vadd.f32 %v3800_v51, %v866_v48  ;;  %v3679_v54 = vpop.f32.mrb[6].mxu0  ;;  %v3802_v55 = vpop.f32.mrb[6].mxu1 }
 0x28f   : > { %4055 = vst [vmem:[%s6326_s20 + $0x8] sm:$0xff] %v4859_v47  ;;  %4057 = vst [vmem:[%s6326_s20 + $0x18] sm:$0xff] %v4861_v49  ;;  %v3680_v56 = vpop.f32.mrb[7].mxu0  ;;  %v3803_v23 = vpop.f32.mrb[7].mxu1 }
 0x290   : > { %4056 = vst [vmem:[%s6326_s20 + $0x10] sm:$0xff] %v4860_v52  ;;  %4058 = vst [vmem:[%s6352_s8] sm:$0xff] %v4862_v53 }
 0x291   : > { %5846 = shalt.err (!%p5843_p1)
}
 0x292   : > { %s5847_s20 = scalar_lea.hbm %s6362_s12, 512  ;;  %s5851_s13 = scalar_lea.hbm %s6513_s4, 1024 }
 0x293   : > { %p5848_p6 = scmp.ne.s32.totalorder %s6362_s12, %s5847_s20  ;;  %p5852_p4 = scmp.lt.u32.totalorder %s6362_s12, %s6513_s4 }
 0x294   : > { %p5853_p9 = scmp.lt.u32.totalorder %s5851_s13, %s5847_s20  ;;  %p5855_p11 = scmp.lt.u32.totalorder %s5847_s20, %s6362_s12 }
 0x295   : > { %p5849_p10 = pnand %p5848_p6, %p6535_p2 }
 0x296   : > { %p5854_p8 = por %p5853_p9, %p5852_p4 }
 0x297   : > { %p5850_p3 = pneg %p5849_p10 }
 0x298   : > { %p5856_p13 = por %p5855_p11, %p5854_p8 }
 0x29a   : > { %p5857_p5 = pnand %p5856_p13, %p5850_p3 }
 0x29c   : > { %5860 = shalt.err (!%p5857_p5)
}
 0x29d   : > { %4931 = dma.vmem_to_hbm [thread:$0]  (%p6535_p2), %s4112_s18, 512, %s6362_s12, %s6365_s19  }
 0x29e   : > { %s4919_s9 = smul.u32 384, %s6003_s24  ;;  %s4095_s27 = sshll.u32 %s6319_s16, 4  ;;  %s4096_s27 = int_to_ptr.vmem [resolvable:$true] %s4095_s27 }
 0x29f   : > { %s4064_s20 = scalar_lea.sflag [#allocation4], %s6239_s1  ;;  %s5861_s29 = scalar_lea.vmem %s4096_s27, 384 }
 0x2a0   : > { %s6390_s13 = scalar_lea.hbm %s6512_s3, %s4919_s9  ;;  %p5862_p7 = scmp.ne.s32.totalorder %s4096_s27, %s5861_s29 }
 0x2a1   : > { %s6020_s7 = smov [#allocation8]  }
 0x2a2   : > { %p5863_p12 = pnand %p5862_p7, %p6535_p2  ;;  %s5865_s15 = sshll.u32 %s6020_s7, 4  ;;  %s5866_s15 = int_to_ptr.vmem [resolvable:$false] %s5865_s15 }
 0x2a3   : > { %s5867_s0 = scalar_lea.vmem %s5866_s15, 768  ;;  %p5868_p1 = scmp.lt.s32.totalorder %s4096_s27, %s5866_s15 }
 0x2a4   : > { %p5864_p0 = pneg %p5863_p12  ;;  %p5869_p6 = scmp.lt.s32.totalorder %s5867_s0, %s5861_s29 }
 0x2a6   : > { %p5870_p10 = por %p5869_p6, %p5868_p1 }
 0x2a8   : > { %p5871_p3 = pnand %p5870_p10, %p5864_p0 }
 0x2aa   : > { %5874 = shalt.err (!%p5871_p3)
}
 0x2ab   : > { %s5875_s16 = scalar_lea.hbm %s6390_s13, 384  ;;  %s5879_s9 = scalar_lea.hbm %s6512_s3, 768 }
 0x2ac   : > { %p5876_p4 = scmp.ne.s32.totalorder %s6390_s13, %s5875_s16  ;;  %p5880_p11 = scmp.lt.u32.totalorder %s6390_s13, %s6512_s3 }
 0x2ad   : > { %p5881_p13 = scmp.lt.u32.totalorder %s5879_s9, %s5875_s16  ;;  %p5883_p7 = scmp.lt.u32.totalorder %s5875_s16, %s6390_s13 }
 0x2ae   : > { %p5877_p9 = pnand %p5876_p4, %p6535_p2 }
 0x2af   : > { %p5882_p5 = por %p5881_p13, %p5880_p11 }
 0x2b0   : > { %p5878_p8 = pneg %p5877_p9 }
 0x2b1   : > { %p5884_p12 = por %p5883_p7, %p5882_p5 }
 0x2b3   : > { %p5885_p0 = pnand %p5884_p12, %p5878_p8 }
 0x2b5   : > { %5888 = shalt.err (!%p5885_p0)
}
 0x2b6   : > { %4930 = dma.vmem_to_hbm [thread:$0]  (%p6535_p2), %s4096_s27, 384, %s6390_s13, %s4064_s20   ;;  %v832_v57 = vld [vmem:[#allocation7 + $0x8] sm:$0xf] }
 0x2b7   : > { %s4356_s0 = sshll.u32 %s6239_s1, 3  ;;  %v870_v58 = vrot.slane %v832_v57, %v837_v17  ;;  %v878_v59 = vrot.slane %v832_v57, %v845_v19  ;;  %s4127_s28 = sshll.u32 %s6352_s8, 4  ;;  %v874_v60 = vrot.slane %v832_v57, %v841_v20  ;;  %v882_v61 = vrot.slane %v832_v57, %v849_v24  ;;  %s6421_s28 = int_to_ptr.vmem [resolvable:$true] %s4127_s28 }
 0x2b8   : > { %s4850_s27 = sshll.u32 %s6003_s24, 7  ;;  %s346_s13 = scalar_lea.vmem [#allocation12], %s4356_s0 }
 0x2b9   : > { %s4141_s20 = sshll.u32 %s346_s13, 4  ;;  %s6536_s29 = sshll.u32 %s6003_s24, 9  ;;  %s6437_s20 = int_to_ptr.vmem [resolvable:$true] %s4141_s20 }
 0x2ba   : > { %s6428_s12 = scalar_lea.hbm %s6514_s5, %s6536_s29  ;;  %s6435_s14 = scalar_lea.hbm %s6515_s6, %s4850_s27 }
 0x2bb   : > { %s5889_s24 = scalar_lea.vmem %s6421_s28, 512  ;;  %s6021_s15 = smov [#allocation11]  }
 0x2bc   : > { %p5890_p1 = scmp.ne.s32.totalorder %s6421_s28, %s5889_s24  ;;  %s5893_s0 = sshll.u32 %s6021_s15, 4  ;;  %s5894_s0 = int_to_ptr.vmem [resolvable:$false] %s5893_s0 }
 0x2bd   : > { %s5895_s29 = scalar_lea.vmem %s5894_s0, 1024  ;;  %p5896_p3 = scmp.lt.s32.totalorder %s6421_s28, %s5894_s0 }
 0x2be   : > { %p5891_p6 = pnand %p5890_p1, %p6535_p2  ;;  %p5897_p4 = scmp.lt.s32.totalorder %s5895_s29, %s5889_s24 }
 0x2c0   : > { %p5892_p10 = pneg %p5891_p6  ;;  %p5898_p9 = por %p5897_p4, %p5896_p3 }
 0x2c2   : > { %p5899_p8 = pnand %p5898_p9, %p5892_p10 }
 0x32c   : > { %v3921_v62 = vpop.f32.mrb[8].mxu0  ;;  %v4044_v63 = vpop.f32.mrb[8].mxu1 }
 0x32d   : > { %v4863_v17 = vadd.f32 %v3921_v62, %v870_v58  ;;  %v4865_v19 = vadd.f32 %v4044_v63, %v878_v59  ;;  %v3923_v0 = vpop.f32.mrb[9].mxu0  ;;  %v4046_v20 = vpop.f32.mrb[9].mxu1 }
 0x32e   : > { %v4864_v12 = vadd.f32 %v3923_v0, %v874_v60  ;;  %v4866_v1 = vadd.f32 %v4046_v20, %v882_v61  ;;  %v3925_v24 = vpop.f32.mrb[10].mxu0  ;;  %v4048_v2 = vpop.f32.mrb[10].mxu1 }
 0x32f   : > { %4059 = vst [vmem:[%s6352_s8 + $0x8] sm:$0xff] %v4863_v17  ;;  %4061 = vst [vmem:[%s6352_s8 + $0x18] sm:$0xff] %v4865_v19  ;;  %v3926_v3 = vpop.f32.mrb[11].mxu0  ;;  %v4049_v5 = vpop.f32.mrb[11].mxu1 }
 0x330   : > { %4060 = vst [vmem:[%s6352_s8 + $0x10] sm:$0xff] %v4864_v12  ;;  %4062 = vst [vmem:[%s346_s13] sm:$0xff] %v4866_v1 }
 0x331   : > { %5902 = shalt.err (!%p5899_p8)
}
 0x332   : > { %s5903_s8 = scalar_lea.hbm %s6428_s12, 512  ;;  %s5907_s7 = scalar_lea.hbm %s6514_s5, 1024 }
 0x333   : > { %p5904_p11 = scmp.ne.s32.totalorder %s6428_s12, %s5903_s8  ;;  %p5908_p7 = scmp.lt.u32.totalorder %s6428_s12, %s6514_s5 }
 0x334   : > { %p5909_p12 = scmp.lt.u32.totalorder %s5907_s7, %s5903_s8  ;;  %p5911_p1 = scmp.lt.u32.totalorder %s5903_s8, %s6428_s12 }
 0x335   : > { %p5905_p13 = pnand %p5904_p11, %p6535_p2 }
 0x336   : > { %p5910_p0 = por %p5909_p12, %p5908_p7 }
 0x337   : > { %p5906_p5 = pneg %p5905_p13 }
 0x338   : > { %p5912_p6 = por %p5911_p1, %p5910_p0 }
 0x33a   : > { %p5913_p10 = pnand %p5912_p6, %p5906_p5 }
 0x33c   : > { %5916 = shalt.err (!%p5913_p10)
}
 0x33d   : > { %4932 = dma.vmem_to_hbm [thread:$0]  (%p6535_p2), %s6421_s28, 512, %s6428_s12, %s6365_s19  }
 0x33e   : > { %s4079_s9 = scalar_lea.sflag [#allocation13], %s6239_s1  ;;  %s5917_s24 = scalar_lea.vmem %s6437_s20, 128 }
 0x33f   : > { %p5918_p3 = scmp.ne.s32.totalorder %s6437_s20, %s5917_s24  ;;  %s6022_s15 = smov [#allocation12]  }
 0x340   : > { %s5921_s0 = sshll.u32 %s6022_s15, 4  ;;  %s5922_s0 = int_to_ptr.vmem [resolvable:$false] %s5921_s0 }
 0x341   : > { %p5919_p4 = pnand %p5918_p3, %p6535_p2  ;;  %s5923_s29 = scalar_lea.vmem %s5922_s0, 256 }
 0x342   : > { %p5924_p8 = scmp.lt.s32.totalorder %s6437_s20, %s5922_s0  ;;  %p5925_p11 = scmp.lt.s32.totalorder %s5923_s29, %s5917_s24 }
 0x343   : > { %p5920_p9 = pneg %p5919_p4 }
 0x344   : > { %p5926_p13 = por %p5925_p11, %p5924_p8 }
 0x346   : > { %p5927_p5 = pnand %p5926_p13, %p5920_p9 }
 0x348   : > { %5930 = shalt.err (!%p5927_p5)
}
 0x349   : > { %s5931_s1 = scalar_lea.hbm %s6435_s14, 128  ;;  %s5935_s12 = scalar_lea.hbm %s6515_s6, 256 }
 0x34a   : > { %p5932_p7 = scmp.ne.s32.totalorder %s6435_s14, %s5931_s1  ;;  %p5936_p1 = scmp.lt.u32.totalorder %s6435_s14, %s6515_s6 }
 0x34b   : > { %p5937_p6 = scmp.lt.u32.totalorder %s5935_s12, %s5931_s1  ;;  %p5939_p3 = scmp.lt.u32.totalorder %s5931_s1, %s6435_s14 }
 0x34c   : > { %p5933_p12 = pnand %p5932_p7, %p6535_p2 }
 0x34d   : > { %p5938_p10 = por %p5937_p6, %p5936_p1 }
 0x34e   : > { %p5934_p0 = pneg %p5933_p12 }
 0x34f   : > { %p5940_p4 = por %p5939_p3, %p5938_p10 }
 0x351   : > { %p5941_p9 = pnand %p5940_p4, %p5934_p0 }
 0x353   : > { %5944 = shalt.err (!%p5941_p9)
}
 0x354   : > { %4933 = dma.vmem_to_hbm [thread:$0]  (%p6535_p2), %s6437_s20, 128, %s6435_s14, %s4079_s9  }
 0x355 PF: > { %s4153_s13 = sand.u32 1, %s5991_s21   ;;  %p6537_p8 = scmp.ne.s32.totalorder %s6524_s30, 0 }
 0x356   : > { %p6538_p11 = scmp.ge.s32.totalorder %s6011_s26, 2  ;;  %s4154_s7 = scalar_lea.sflag [#allocation4], %s4153_s13 }
 0x358   : > { %p4950_p13 = pnand %p6538_p11, %p6537_p8 }
 0x35a   : > { %5978 = dma.done.wait (!%p4950_p13), %s4154_s7, 384  }
 0x35b   : > { %5980 = vsyncadd (!%p4950_p13), %s4154_s7, 4294966912  ;;  %s6539_s16 = sadd.s32 4294967294, %s6011_s26  }
 0x35c   : > { %s4162_s18 = sand.u32 1, %s6539_s16  }
 0x35d   : > { %s4163_s24 = scalar_lea.sflag [#allocation10], %s4162_s18 }
 0x35e   : > { %5982 = dma.done.wait (!%p4950_p13), %s4163_s24, 1024  }
 0x35f   : > { %5984 = vsyncadd (!%p4950_p13), %s4163_s24, 4294966272  ;;  %s4181_s10 = scalar_lea.sflag [#allocation13], %s4153_s13 }
 0x360   : > { %5986 = dma.done.wait (!%p4950_p13), %s4181_s10, 128  }
 0x361   : > { %5988 = vsyncadd (!%p4950_p13), %s4181_s10, 4294967168  ;;  %s30_s26 = sadd.s32 1, %s6011_s26   ;;  %s6540_s21 = smov %s5995_s22 }
 0x362   : > { %p27_p2 = scmp.ge.s32.totalorder %s30_s26, 4   ;;  %s6541_s22 = smov %s5999_s23 }
 0x363   : > { %s6542_s23 = smov %s6201_s17  ;;  %s6543_s24 = smov %s6007_s25 }
 0x364   : > { %s6544_s25 = smov %s6546_s11  ;;  %29 = sbr.rel (!%p27_p2) target bundleno = 14 (0xe), region = 134 }
 0x36b   :  { %4186 = vsyncpa [#allocation3], 1 }
 0x36c   :  { %4188 = vsyncpa [#allocation3 + $0x1], 1 }
 0x36d   :  { %4189 = vsyncpa [#allocation6], 1 }
 0x36e   :  { %4190 = vsyncpa [#allocation4], 1 }
 0x36f   :  { %4192 = vsyncpa [#allocation4 + $0x1], 1 }
 0x370   :  { %4193 = vsyncpa [#allocation10], 1 }
 0x371   :  { %4195 = vsyncpa [#allocation10 + $0x1], 1 }
 0x372   :  { %4196 = vsyncpa [#allocation13], 1 }
 0x373   :  { %4198 = vsyncpa [#allocation13 + $0x1], 1 }

</bundles_post_ra>
